<compile_context>
chip_gen: v5e
topology: v5e:2x2
jax: 0.10.0
libtpu: 0.0.40
codegen_flags: <defaults>
</compile_context>

<pallas_src>
import functools
import warnings

import jax
import jax.numpy as jnp
from jax.experimental import pallas as pl
from jax.experimental.pallas import tpu as pltpu


def _cdiv(a, b):
    return (a + b - 1) // b


def _round_up(a, b):
    return _cdiv(a, b) * b


def _mxu_lane_width():
    """MXU tile width used for the group-split heuristic: 256 on v6e/v7x, 128 on v2-v5."""
    try:
        kind = jax.devices()[0].device_kind.lower()
    except Exception:
        return 256
    if any(tag in kind for tag in ("v2", "v3", "v4", "v5")):
        return 128
    return 256


def _choose_groups(in_dim, out_dim, pack, gw):
    """Number of diagonal groups to split a packed layer's matmul into.

    kron(I_pack, W) is block diagonal; splitting the dot into `ng` diagonal
    groups skips the all-zero MXU tiles.  Among divisors of `pack` whose K/N
    bands are 128-lane aligned (so h lane-slices and the output concat stay
    vreg aligned), pick the split minimizing MXU pushes
    ng * ceil(Kb/gw) * ceil(Nb/gw); ties go to fewer groups (simpler graph).
    """
    k_total, n_total = pack * in_dim, pack * out_dim
    best_ng = 1
    best_cost = _cdiv(k_total, gw) * _cdiv(n_total, gw)
    for ng in range(2, pack + 1):
        if pack % ng:
            continue
        kb, nb = k_total // ng, n_total // ng
        if kb % 128 or nb % 128:
            continue
        cost = ng * _cdiv(kb, gw) * _cdiv(nb, gw)
        if cost < best_cost:
            best_ng, best_cost = ng, cost
    return best_ng


# ----------------------------------------------------------------------------
# One-time parameter packing (cache the result; do NOT rerun per forward call).
# ----------------------------------------------------------------------------
def prepare_basic_decoder(params, mxu_width=None):
    """Pack BasicDecoder parameters for the Pallas kernel.

    params: [(W0, b0), ..., (W_{L-1}, b_{L-1}), (W_out, b_out)],
            W stored as [in, out] (PyTorch weight.T), b as [out].
    Returns (plan, flat_params, input_dim, output_dim, pack); reuse it across
    forward calls so the kron/cast/tile work costs nothing in steady state.
    """
    input_dim = params[0][0].shape[0]
    output_dim = params[-1][0].shape[1]
    gw = _mxu_lane_width() if mxu_width is None else mxu_width

    if 0 < output_dim <= 128 and 128 % output_dim == 0:
        pack = 128 // output_dim
    else:
        pack = 1
        warnings.warn(
            "output_dim does not divide 128: falling back to pack=1 "
            "(masked narrow stores and tiny matmuls -> large performance cliff).")

    plan = []
    flat = []
    for li, (w, b) in enumerate(params):
        in_d, out_d = w.shape
        ng = _choose_groups(in_d, out_d, pack, gw)
        r = pack // ng
        # All diagonal blocks of kron(I_pack, W) are identical -> ship a single
        # [r*in, r*out] group weight (bf16) reused for every diagonal group.
        w_g = jnp.kron(jnp.eye(r, dtype=jnp.float32),
                       jnp.asarray(w, jnp.float32)).astype(jnp.bfloat16)
        b_t = jnp.tile(jnp.asarray(b, jnp.float32).reshape(1, -1), (1, pack))
        is_last = li == len(params) - 1
        plan.append((ng, r * in_d, not is_last))
        flat.append(w_g)
        flat.append(b_t)
    return tuple(plan), flat, input_dim, output_dim, pack


# ----------------------------------------------------------------------------
# Pallas kernel: the entire MLP (all matmuls + bias + relu) fused, tiled over
# packed ("wide") rows of the flattened input.
# ----------------------------------------------------------------------------
def _mlp_kernel(plan, *refs):
    # refs layout: x_ref, (w0,b0, w1,b1, ..., wout,bout), out_ref
    x_ref = refs[0]
    out_ref = refs[-1]
    p = refs[1:-1]

    # In-kernel f32 -> bf16 cast: free VPU work under MXU slack, and it removes
    # the wrapper-side cast pass over x through HBM.
    h = x_ref[...].astype(jnp.bfloat16)
    for li, (ng, kb, act) in enumerate(plan):
        w = p[2 * li][...]        # (kb, nb) bf16 shared diagonal-group weight
        b = p[2 * li + 1][...]    # (1, pack*out) f32 tiled bias
        # Only the ng nonzero diagonal groups of the block-diagonal weight are
        # multiplied; the h lane slices and the concat are at multiples of 128
        # lanes, so they are vreg aligned.
        pieces = [
            jnp.dot(h[:, g * kb:(g + 1) * kb], w,
                    preferred_element_type=jnp.float32)
            for g in range(ng)
        ]
        a = (pieces[0] if ng == 1 else jnp.concatenate(pieces, axis=-1)) + b
        h = jnp.maximum(a, 0.0).astype(jnp.bfloat16) if act else a
    out_ref[...] = h.astype(out_ref.dtype)


# ----------------------------------------------------------------------------
# Wrapper
# ----------------------------------------------------------------------------
def basic_decoder_forward(x, prepared, *, tile_n=32768):
    """Run the BasicDecoder MLP forward pass.

    x:        [batch, ..., input_dim] float array (kept in its own dtype; cast
              to bf16 inside the kernel).
    prepared: output of prepare_basic_decoder(params).
    tile_n:   approximate number of original rows per grid step (sweep
              16384-65536 on real workloads).
    """
    plan, flat, input_dim, output_dim, pack = prepared
    orig_shape = x.shape
    assert orig_shape[-1] == input_dim, "last dim of x must equal input_dim"

    x2 = x.reshape(-1, input_dim)                    # free row-major view
    n_rows = x2.shape[0]
    rem = n_rows % pack
    if rem:                                          # pad only up to pack-1 rows
        x2 = jnp.pad(x2, ((0, pack - rem), (0, 0)))
    n_rows_pad = x2.shape[0]
    n_wide = n_rows_pad // pack
    x_wide = x2.reshape(n_wide, pack * input_dim)    # free row-major view
    wide_out = pack * output_dim

    # Row tile: big enough to amortize the ~0.35us grid-step overhead, clamped
    # so the grid keeps >=2 steps (v7x's two TensorCores) and so the last
    # (ragged) block is handled by Pallas instead of padding a full tile.
    tile_r = _round_up(max(1, tile_n // pack), 8)
    if n_wide >= 16:
        tile_r = min(tile_r, _round_up(_cdiv(n_wide, 2), 8))
    if n_wide >= 8:
        tile_r = min(tile_r, (n_wide // 8) * 8)
    else:
        tile_r = n_wide
    grid = (_cdiv(n_wide, tile_r),)

    in_specs = [pl.BlockSpec((tile_r, pack * input_dim), lambda i: (i, 0))]
    for arr in flat:
        # Constant block index -> each parameter is DMA'd once and stays
        # resident in VMEM across the whole grid.
        in_specs.append(pl.BlockSpec(arr.shape, lambda i: (0, 0)))
    out_spec = pl.BlockSpec((tile_r, wide_out), lambda i: (i, 0))

    out_wide = pl.pallas_call(
        functools.partial(_mlp_kernel, plan),
        out_shape=jax.ShapeDtypeStruct((n_wide, wide_out), jnp.float32),
        grid_spec=pltpu.PrefetchScalarGridSpec(
            num_scalar_prefetch=0,
            grid=grid,
            in_specs=in_specs,
            out_specs=out_spec,
        ),
        compiler_params=pltpu.CompilerParams(
            dimension_semantics=("parallel",),       # v7x: 2 TCs split the grid
            vmem_limit_bytes=48 * 1024 * 1024,       # > v5e 16MiB default, < v7x 64MiB phys
        ),
    )(x_wide, *flat)

    out = out_wide.reshape(n_rows_pad, output_dim)   # free view
    if rem:
        out = out[:n_rows]
    return out.reshape(*orig_shape[:-1], output_dim)


# ----------------------------------------------------------------------------
# Pure-JAX reference.  compute_dtype=bf16 mirrors the kernel's numerics;
# compute_dtype=f32 mirrors the PyTorch module's numerics.
# ----------------------------------------------------------------------------
def reference_forward(x, params, compute_dtype=jnp.bfloat16):
    orig_shape = x.shape
    h = x.reshape(-1, orig_shape[-1]).astype(jnp.float32)
    num_layers = len(params) - 1
    for i in range(num_layers):
        w, b = params[i]
        a = jnp.dot(h.astype(compute_dtype), w.astype(compute_dtype),
                    preferred_element_type=jnp.float32)
        h = jnp.maximum(a + b.astype(jnp.float32), 0.0)
    w_out, b_out = params[-1]
    out = jnp.dot(h.astype(compute_dtype), w_out.astype(compute_dtype),
                  preferred_element_type=jnp.float32) + b_out.astype(jnp.float32)
    return out.reshape(*orig_shape[:-1], w_out.shape[1])


# ----------------------------------------------------------------------------
# Deterministic parameter init (synthetic; shapes follow BasicDecoder.init()).
# ----------------------------------------------------------------------------
def init_params(key, input_dim, hidden_dim, output_dim, num_layers):
    params = []
    in_dim = input_dim
    for _ in range(num_layers):
        key, kw, kb = jax.random.split(key, 3)
        bound = 1.0 / jnp.sqrt(in_dim)
        w = jax.random.uniform(kw, (in_dim, hidden_dim), jnp.float32, -bound, bound)
        b = jax.random.uniform(kb, (hidden_dim,), jnp.float32, -bound, bound)
        params.append((w, b))
        in_dim = hidden_dim
    key, kw, kb = jax.random.split(key, 3)
    bound = 1.0 / jnp.sqrt(hidden_dim)
    w_out = jax.random.uniform(kw, (hidden_dim, output_dim), jnp.float32, -bound, bound)
    b_out = jax.random.uniform(kb, (output_dim,), jnp.float32, -bound, bound)
    params.append((w_out, b_out))
    return params


if __name__ == "__main__":
    # Small shapes: x is [batch, samples, input_dim] = [2, 517, 16] -> 1034 rows.
    # 1034 is deliberately NOT a multiple of pack=16 nor of the row tile, so the
    # pad-to-pack and ragged-last-block paths are both exercised.
    batch, samples = 2, 517
    input_dim, hidden_dim, output_dim = 16, 32, 8
    num_layers = 3

    key = jax.random.PRNGKey(0)
    key, kx = jax.random.split(key)
    x = jax.random.normal(kx, (batch, samples, input_dim), jnp.float32)
    params = init_params(key, input_dim, hidden_dim, output_dim, num_layers)

    prepared = prepare_basic_decoder(params)      # once per parameter set

    # Small tile so the tiny test still runs a multi-step grid; production use
    # keeps the default tile_n=32768 (second call below).
    out_small = basic_decoder_forward(x, prepared, tile_n=512)
    out_default = basic_decoder_forward(x, prepared)
    out_small, out_default = jax.block_until_ready((out_small, out_default))

    ref_bf16 = reference_forward(x, params)                            # kernel numerics
    ref_f32 = reference_forward(x, params, compute_dtype=jnp.float32)  # PyTorch numerics

    for out in (out_small, out_default):
        assert out.shape == (batch, samples, output_dim)
        err_b = float(jnp.max(jnp.abs(out - ref_bf16)))
        assert jnp.allclose(out, ref_bf16, atol=1e-3, rtol=1e-3), \
            f"mismatch vs bf16 reference: {err_b}"
        err_f = float(jnp.max(jnp.abs(out - ref_f32)))
        assert jnp.allclose(out, ref_f32, atol=3e-2, rtol=3e-2), \
            f"mismatch vs f32 reference: {err_f}"

    # TODO(synk): batch_norm / skip ('add'/'concat') / gaussian-activation code
    # paths of BasicDecoder are not exercised by the default config implemented.
    print("KERNEL_OK")
</pallas_src>

<mosaic_0001>
module attributes {stable_mosaic.version = 11 : i64} {
  func.func @_mlp_kernel(%arg0: i32, %arg1: memref<32x256xf32, #tpu.memory_space<vmem>>, %arg2: memref<256x512xbf16, #tpu.memory_space<vmem>>, %arg3: memref<1x512xf32, #tpu.memory_space<vmem>>, %arg4: memref<256x256xbf16, #tpu.memory_space<vmem>>, %arg5: memref<1x512xf32, #tpu.memory_space<vmem>>, %arg6: memref<256x256xbf16, #tpu.memory_space<vmem>>, %arg7: memref<1x512xf32, #tpu.memory_space<vmem>>, %arg8: memref<512x128xbf16, #tpu.memory_space<vmem>>, %arg9: memref<1x128xf32, #tpu.memory_space<vmem>>, %arg10: memref<32x128xf32, #tpu.memory_space<vmem>>) attributes {dimension_semantics = [#tpu.dimension_semantics<parallel>], iteration_bounds = array<i64: 3>, scalar_prefetch = 0 : i64, scratch_operands = 0 : i64, tpu.core_type = #tpu.core_type<tc>, window_params = [{transform_indices = @transform_0, window_bounds = array<i64: 32, 256>}, {pipeline_mode = #tpu.pipeline_mode<synchronous>, transform_indices = @transform_1, window_bounds = array<i64: 256, 512>}, {pipeline_mode = #tpu.pipeline_mode<synchronous>, transform_indices = @transform_2, window_bounds = array<i64: 1, 512>}, {pipeline_mode = #tpu.pipeline_mode<synchronous>, transform_indices = @transform_3, window_bounds = array<i64: 256, 256>}, {pipeline_mode = #tpu.pipeline_mode<synchronous>, transform_indices = @transform_4, window_bounds = array<i64: 1, 512>}, {pipeline_mode = #tpu.pipeline_mode<synchronous>, transform_indices = @transform_5, window_bounds = array<i64: 256, 256>}, {pipeline_mode = #tpu.pipeline_mode<synchronous>, transform_indices = @transform_6, window_bounds = array<i64: 1, 512>}, {pipeline_mode = #tpu.pipeline_mode<synchronous>, transform_indices = @transform_7, window_bounds = array<i64: 512, 128>}, {pipeline_mode = #tpu.pipeline_mode<synchronous>, transform_indices = @transform_8, window_bounds = array<i64: 1, 128>}, {transform_indices = @transform_9, window_bounds = array<i64: 32, 128>}]} {
    %c0 = arith.constant 0 : index
    %c0_0 = arith.constant 0 : index
    %0 = vector.load %arg1[%c0, %c0_0] : memref<32x256xf32, #tpu.memory_space<vmem>>, vector<32x256xf32>
    %1 = arith.truncf %0 : vector<32x256xf32> to vector<32x256xbf16>
    %c0_1 = arith.constant 0 : index
    %c0_2 = arith.constant 0 : index
    %2 = vector.load %arg2[%c0_1, %c0_2] : memref<256x512xbf16, #tpu.memory_space<vmem>>, vector<256x512xbf16>
    %c0_3 = arith.constant 0 : index
    %c0_4 = arith.constant 0 : index
    %3 = vector.load %arg3[%c0_3, %c0_4] : memref<1x512xf32, #tpu.memory_space<vmem>>, vector<1x512xf32>
    %cst = arith.constant dense<0.000000e+00> : vector<32x512xf32>
    %4 = tpu.matmul %1, %2, %cst {dimension_numbers = #tpu.dot_dimension_numbers<[1], [0], [0], [1], [0, 0, 1, 1], [], []>} : vector<32x256xbf16>, vector<256x512xbf16>, vector<32x512xf32> -> vector<32x512xf32>
    %5 = vector.broadcast %3 : vector<1x512xf32> to vector<32x512xf32>
    %6 = arith.addf %4, %5 : vector<32x512xf32>
    %cst_5 = arith.constant 0.000000e+00 : f32
    %7 = vector.broadcast %cst_5 : f32 to vector<32x512xf32>
    %8 = arith.maximumf %6, %7 : vector<32x512xf32>
    %9 = arith.truncf %8 : vector<32x512xf32> to vector<32x512xbf16>
    %c0_6 = arith.constant 0 : index
    %c0_7 = arith.constant 0 : index
    %10 = vector.load %arg4[%c0_6, %c0_7] : memref<256x256xbf16, #tpu.memory_space<vmem>>, vector<256x256xbf16>
    %c0_8 = arith.constant 0 : index
    %c0_9 = arith.constant 0 : index
    %11 = vector.load %arg5[%c0_8, %c0_9] : memref<1x512xf32, #tpu.memory_space<vmem>>, vector<1x512xf32>
    %12 = vector.extract_strided_slice %9 {offsets = [0, 0], sizes = [32, 256], strides = [1, 1]} : vector<32x512xbf16> to vector<32x256xbf16>
    %cst_10 = arith.constant dense<0.000000e+00> : vector<32x256xf32>
    %13 = tpu.matmul %12, %10, %cst_10 {dimension_numbers = #tpu.dot_dimension_numbers<[1], [0], [0], [1], [0, 0, 1, 1], [], []>} : vector<32x256xbf16>, vector<256x256xbf16>, vector<32x256xf32> -> vector<32x256xf32>
    %14 = vector.extract_strided_slice %9 {offsets = [0, 256], sizes = [32, 256], strides = [1, 1]} : vector<32x512xbf16> to vector<32x256xbf16>
    %cst_11 = arith.constant dense<0.000000e+00> : vector<32x256xf32>
    %15 = tpu.matmul %14, %10, %cst_11 {dimension_numbers = #tpu.dot_dimension_numbers<[1], [0], [0], [1], [0, 0, 1, 1], [], []>} : vector<32x256xbf16>, vector<256x256xbf16>, vector<32x256xf32> -> vector<32x256xf32>
    %16 = tpu.concatenate %13, %15 in 1 : vector<32x256xf32>, vector<32x256xf32> -> vector<32x512xf32>
    %17 = vector.broadcast %11 : vector<1x512xf32> to vector<32x512xf32>
    %18 = arith.addf %16, %17 : vector<32x512xf32>
    %cst_12 = arith.constant 0.000000e+00 : f32
    %19 = vector.broadcast %cst_12 : f32 to vector<32x512xf32>
    %20 = arith.maximumf %18, %19 : vector<32x512xf32>
    %21 = arith.truncf %20 : vector<32x512xf32> to vector<32x512xbf16>
    %c0_13 = arith.constant 0 : index
    %c0_14 = arith.constant 0 : index
    %22 = vector.load %arg6[%c0_13, %c0_14] : memref<256x256xbf16, #tpu.memory_space<vmem>>, vector<256x256xbf16>
    %c0_15 = arith.constant 0 : index
    %c0_16 = arith.constant 0 : index
    %23 = vector.load %arg7[%c0_15, %c0_16] : memref<1x512xf32, #tpu.memory_space<vmem>>, vector<1x512xf32>
    %24 = vector.extract_strided_slice %21 {offsets = [0, 0], sizes = [32, 256], strides = [1, 1]} : vector<32x512xbf16> to vector<32x256xbf16>
    %cst_17 = arith.constant dense<0.000000e+00> : vector<32x256xf32>
    %25 = tpu.matmul %24, %22, %cst_17 {dimension_numbers = #tpu.dot_dimension_numbers<[1], [0], [0], [1], [0, 0, 1, 1], [], []>} : vector<32x256xbf16>, vector<256x256xbf16>, vector<32x256xf32> -> vector<32x256xf32>
    %26 = vector.extract_strided_slice %21 {offsets = [0, 256], sizes = [32, 256], strides = [1, 1]} : vector<32x512xbf16> to vector<32x256xbf16>
    %cst_18 = arith.constant dense<0.000000e+00> : vector<32x256xf32>
    %27 = tpu.matmul %26, %22, %cst_18 {dimension_numbers = #tpu.dot_dimension_numbers<[1], [0], [0], [1], [0, 0, 1, 1], [], []>} : vector<32x256xbf16>, vector<256x256xbf16>, vector<32x256xf32> -> vector<32x256xf32>
    %28 = tpu.concatenate %25, %27 in 1 : vector<32x256xf32>, vector<32x256xf32> -> vector<32x512xf32>
    %29 = vector.broadcast %23 : vector<1x512xf32> to vector<32x512xf32>
    %30 = arith.addf %28, %29 : vector<32x512xf32>
    %cst_19 = arith.constant 0.000000e+00 : f32
    %31 = vector.broadcast %cst_19 : f32 to vector<32x512xf32>
    %32 = arith.maximumf %30, %31 : vector<32x512xf32>
    %33 = arith.truncf %32 : vector<32x512xf32> to vector<32x512xbf16>
    %c0_20 = arith.constant 0 : index
    %c0_21 = arith.constant 0 : index
    %34 = vector.load %arg8[%c0_20, %c0_21] : memref<512x128xbf16, #tpu.memory_space<vmem>>, vector<512x128xbf16>
    %c0_22 = arith.constant 0 : index
    %c0_23 = arith.constant 0 : index
    %35 = vector.load %arg9[%c0_22, %c0_23] : memref<1x128xf32, #tpu.memory_space<vmem>>, vector<1x128xf32>
    %cst_24 = arith.constant dense<0.000000e+00> : vector<32x128xf32>
    %36 = tpu.matmul %33, %34, %cst_24 {dimension_numbers = #tpu.dot_dimension_numbers<[1], [0], [0], [1], [0, 0, 1, 1], [], []>} : vector<32x512xbf16>, vector<512x128xbf16>, vector<32x128xf32> -> vector<32x128xf32>
    %37 = vector.broadcast %35 : vector<1x128xf32> to vector<32x128xf32>
    %38 = arith.addf %36, %37 : vector<32x128xf32>
    %c0_25 = arith.constant 0 : index
    %c0_26 = arith.constant 0 : index
    %39 = vector.load %arg10[%c0_25, %c0_26] : memref<32x128xf32, #tpu.memory_space<vmem>>, vector<32x128xf32>
    tpu.vector_store %arg10[%c0_25, %c0_26], %38 {strides = array<i32>} : memref<32x128xf32, #tpu.memory_space<vmem>>, vector<32x128xf32>,
    return
  }
  func.func @transform_0(%arg0: i32) -> (i32, i32) {
    %c0_i32 = arith.constant 0 : i32
    %c0_i32_0 = arith.constant 0 : i32
    return %arg0, %c0_i32 : i32, i32
  }
  func.func @transform_1(%arg0: i32) -> (i32, i32) {
    %c0_i32 = arith.constant 0 : i32
    %c0_i32_0 = arith.constant 0 : i32
    %c0_i32_1 = arith.constant 0 : i32
    return %c0_i32, %c0_i32_0 : i32, i32
  }
  func.func @transform_2(%arg0: i32) -> (i32, i32) {
    %c0_i32 = arith.constant 0 : i32
    %c0_i32_0 = arith.constant 0 : i32
    %c0_i32_1 = arith.constant 0 : i32
    return %c0_i32, %c0_i32_0 : i32, i32
  }
  func.func @transform_3(%arg0: i32) -> (i32, i32) {
    %c0_i32 = arith.constant 0 : i32
    %c0_i32_0 = arith.constant 0 : i32
    %c0_i32_1 = arith.constant 0 : i32
    return %c0_i32, %c0_i32_0 : i32, i32
  }
  func.func @transform_4(%arg0: i32) -> (i32, i32) {
    %c0_i32 = arith.constant 0 : i32
    %c0_i32_0 = arith.constant 0 : i32
    %c0_i32_1 = arith.constant 0 : i32
    return %c0_i32, %c0_i32_0 : i32, i32
  }
  func.func @transform_5(%arg0: i32) -> (i32, i32) {
    %c0_i32 = arith.constant 0 : i32
    %c0_i32_0 = arith.constant 0 : i32
    %c0_i32_1 = arith.constant 0 : i32
    return %c0_i32, %c0_i32_0 : i32, i32
  }
  func.func @transform_6(%arg0: i32) -> (i32, i32) {
    %c0_i32 = arith.constant 0 : i32
    %c0_i32_0 = arith.constant 0 : i32
    %c0_i32_1 = arith.constant 0 : i32
    return %c0_i32, %c0_i32_0 : i32, i32
  }
  func.func @transform_7(%arg0: i32) -> (i32, i32) {
    %c0_i32 = arith.constant 0 : i32
    %c0_i32_0 = arith.constant 0 : i32
    %c0_i32_1 = arith.constant 0 : i32
    return %c0_i32, %c0_i32_0 : i32, i32
  }
  func.func @transform_8(%arg0: i32) -> (i32, i32) {
    %c0_i32 = arith.constant 0 : i32
    %c0_i32_0 = arith.constant 0 : i32
    %c0_i32_1 = arith.constant 0 : i32
    return %c0_i32, %c0_i32_0 : i32, i32
  }
  func.func @transform_9(%arg0: i32) -> (i32, i32) {
    %c0_i32 = arith.constant 0 : i32
    %c0_i32_0 = arith.constant 0 : i32
    return %arg0, %c0_i32 : i32, i32
  }
}

</mosaic_0001>

<bundles_post_ra>
// kernel: tpu_custom_call.1
= control target key start
LH: loop header
LB: loop body
LE: loop exit
PB: predicated region body
PF: predicated region fallthrough
CT: control target
= control target key end

     0   :  { %s4326_s0 = inlined_call_operand.hbm [shape: f32[65,256], index: 0, kind: input, shape index: {}]   ;;  %s4327_s1 = inlined_call_operand.hbm [shape: bf16[256,512], index: 1, kind: input, shape index: {}]   ;;  %s4328_s2 = inlined_call_operand.hbm [shape: f32[1,512], index: 2, kind: input, shape index: {}]   ;;  %s4329_s3 = inlined_call_operand.hbm [shape: bf16[256,256], index: 3, kind: input, shape index: {}]   ;;  %s4330_s4 = inlined_call_operand.hbm [shape: f32[1,512], index: 4, kind: input, shape index: {}]   ;;  %s4331_s5 = inlined_call_operand.hbm [shape: bf16[256,256], index: 5, kind: input, shape index: {}]   ;;  %s4332_s6 = inlined_call_operand.vmem [shape: f32[1,512], index: 6, kind: input, shape index: {}]   ;;  %s4333_s7 = inlined_call_operand.hbm [shape: bf16[512,128], index: 7, kind: input, shape index: {}]   ;;  %s4334_s8 = inlined_call_operand.vmem [shape: f32[1,128], index: 8, kind: input, shape index: {}]   ;;  %s4335_s9 = inlined_call_operand.hbm [shape: f32[65,128], index: 9, kind: output, shape index: {}]  }
   0x1   :  { %4343 = sst [smem:[#allocation25_spill]] %s4327_s1 }
   0x2   :  { %4344 = sst [smem:[#allocation26_spill]] %s4329_s3 }
   0x3   :  { %4345 = sst [smem:[#allocation27_spill]] %s4335_s9 }
   0x4   :  { %14 = vsyncpa [#allocation3], 0 }
   0x5   :  { %16 = vsyncpa [#allocation3 + $0x1], 0 }
   0x6   :  { %17 = vsyncpa [#allocation6], 0 }
   0x7   :  { %18 = vsyncpa [#allocation9], 0 }
   0x8   :  { %19 = vsyncpa [#allocation12], 0 }
   0x9   :  { %20 = vsyncpa [#allocation4], 0 }
   0xa   :  { %22 = vsyncpa [#allocation4 + $0x1], 0  ;;  %s3740_s30 = smov 0   ;;  %s3742_s10 = smov 0  }
   0xb   :  { %s3744_s11 = smov 0   ;;  %s3746_s12 = smov 0  }
   0xc LB: > { %4346 = sst [smem:[#allocation20_spill]] %s3658_s30  ;;  %s3761_s13 = sadd.s32 4294967295, %s3670_s12   ;;  %s3670_s12 = sphi %s3746_s12, %s4372_s12   ;;  %s3666_s11 = sphi %s3744_s11, %s4376_s11   ;;  %s3662_s10 = sphi %s3742_s10, %s4375_s10   ;;  %s3658_s30 = sphi %s3740_s30, %s4374_s30  }
   0xd   : > { %s2411_s14 = sadd.s32 4294967294, %s3670_s12   ;;  %s3765_s15 = sadd.s32 1, %s3670_s12  }
   0xe   : > { %4347 = sst [smem:[#allocation21_spill]] %s3765_s15  ;;  %s35_s16 = sadd.s32 1, %s3666_s11 }
   0xf   : > { %s32_s17 = ssub.s32 %s3670_s12, %s3765_s15  ;;  %p42_p0 = scmp.ne.s32.totalorder %s3666_s11, %s3662_s10 }
  0x10   : > { %p33_p1 = scmp.eq.s32.totalorder %s32_s17, 0  ;;  %p43_p2 = scmp.eq.s32.totalorder %s3670_s12, 0 }
  0x11   : > { %p48_p3 = scmp.ne.s32.totalorder %s3662_s10, %s3658_s30  ;;  %p4342_p4 = scmp.eq.s32.totalorder %s3761_s13, 0 }
  0x12   : > { %s3777_s18 = scalar_select %p33_p1, %s3666_s11, %s35_s16  }
  0x13   : > { %p3779_p5 = por %p43_p2, %p42_p0  ;;  %p3785_p6 = por %p4342_p4, %p48_p3 }
  0x14   : > { %4348 = sst [smem:[#allocation22_spill]] %s3777_s18  ;;  %p240_p7 = scmp.eq.s32.totalorder %s3761_s13, 2 }
  0x15   : > { %p246_p8 = scmp.eq.s32.totalorder %s2411_s14, 2  ;;  %p2412_p9 = scmp.ge.s32.totalorder %s3670_s12, 1 }
  0x16   : > { %p253_p10 = scmp.lt.s32.totalorder %s3670_s12, 4  ;;  %p3792_p11 = por %p240_p7, %p42_p0 }
  0x17   : > { %p3796_p12 = por %p246_p8, %p48_p3  ;;  %s4356_s1 = sld [smem:[#allocation25_spill]] }
  0x18   : > { %s4351_s21 = scalar_select %p3792_p11, 1, 0 }
  0x19   : > { %s4353_s22 = scalar_select %p3796_p12, 1, 0 }
  0x1a   : > { %4352 = sst [smem:[#allocation23_spill]] %s4351_s21  ;;  %p3800_p13 = pnand %p2412_p9, %p253_p10 }
  0x1b   : > { %4354 = sst [smem:[#allocation24_spill]] %s4353_s22  ;;  %s3672_s27 = smov [#allocation5]  }
  0x1c   : > { %p3277_p1 = pneg %p3800_p13  ;;  %s266_s28 = sshll.u32 %s3672_s27, 4  ;;  %s267_s28 = int_to_ptr.vmem [resolvable:$true] %s266_s28 }
  0x1d   : > { %s264_s26 = sshll.u32 %s4356_s1, 4  ;;  %s4358_s3 = sld [smem:[#allocation26_spill]]  ;;  %s265_s26 = int_to_ptr.hbm [resolvable:$true] %s264_s26 }
  0x1e   : > { %p3811_p0 = pnand %p3277_p1, %p4342_p4  ;;  %s3673_s24 = smov 256  }
  0x1f   : > { %s3674_s25 = smov 16   ;;  %s3675_s1 = smov [#allocation8]  }
  0x20   : > { %3280 = dma.hbm_to_vmem [thread:$0]  (!%p3811_p0), %s265_s26, 8192, %s267_s28, [#allocation6], %s3673_s24, %s3673_s24, %s3674_s25  }
  0x21   : > { %s292_s27 = sshll.u32 %s3675_s1, 4  ;;  %s316_s22 = sshll.u32 %s4331_s5, 4  ;;  %s293_s27 = int_to_ptr.vmem [resolvable:$true] %s292_s27  ;;  %s317_s22 = int_to_ptr.hbm [resolvable:$true] %s316_s22 }
  0x22   : > { %s3676_s30 = smov 128   ;;  %s3677_s9 = smov 8  }
  0x23   : > { %s290_s17 = sshll.u32 %s4358_s3, 4  ;;  %s3678_s14 = smov [#allocation11]   ;;  %s291_s17 = int_to_ptr.hbm [resolvable:$true] %s290_s17 }
  0x24   : > { %3286 = dma.hbm_to_vmem [thread:$0]  (!%p3811_p0), %s291_s17, 4096, %s293_s27, [#allocation9], %s3676_s30, %s3676_s30, %s3677_s9  }
  0x25   : > { %s318_s16 = sshll.u32 %s3678_s14, 4  ;;  %s279_s26 = sshll.u32 %s4328_s2, 4  ;;  %s319_s16 = int_to_ptr.vmem [resolvable:$true] %s318_s16  ;;  %s280_s26 = int_to_ptr.hbm [resolvable:$true] %s279_s26 }
  0x26   : > { %3292 = dma.hbm_to_vmem [thread:$0]  (!%p3811_p0), %s317_s22, 4096, %s319_s16, [#allocation12], %s3676_s30, %s3676_s30, %s3677_s9  }
  0x27   : > { %s305_s18 = sshll.u32 %s4330_s4, 4  ;;  %s3679_s28 = smov [#allocation7]   ;;  %s306_s18 = int_to_ptr.hbm [resolvable:$true] %s305_s18 }
  0x28   : > { %s281_s24 = sshll.u32 %s3679_s28, 4  ;;  %s3680_s17 = smov [#allocation10]   ;;  %s282_s24 = int_to_ptr.vmem [resolvable:$true] %s281_s24 }
  0x29   : > { %3283 = dma.hbm_to_vmem [thread:$0]  (!%p3811_p0), %s280_s26, 64, %s282_s24, [#allocation6]  }
  0x2a   : > { %s307_s25 = sshll.u32 %s3680_s17, 4  ;;  %s333_s27 = sshll.u32 %s4333_s7, 4  ;;  %s308_s25 = int_to_ptr.vmem [resolvable:$true] %s307_s25  ;;  %s334_s27 = int_to_ptr.hbm [resolvable:$true] %s333_s27 }
  0x2b   : > { %3289 = dma.hbm_to_vmem [thread:$0]  (!%p3811_p0), %s306_s18, 64, %s308_s25, [#allocation9]  }
  0x2c   : > { %s3681_s9 = smov [#allocation13]   ;;  %s3682_s22 = smov 64  }
  0x2d   : > { %s335_s30 = sshll.u32 %s3681_s9, 4  ;;  %s3683_s14 = smov 4   ;;  %s336_s30 = int_to_ptr.vmem [resolvable:$true] %s335_s30 }
  0x2e   : > { %3295 = dma.hbm_to_vmem [thread:$0]  (!%p3811_p0), %s334_s27, 4096, %s336_s30, [#allocation12], %s3682_s22, %s3682_s22, %s3683_s14  }
  0x2f   : > { %p2419_p2 = scmp.ge.s32.totalorder %s3670_s12, 3 }
  0x31   : > { %348 = sbr.rel (%p2419_p2) target bundleno = 90 (0x5a), region = 48 }
  0x36   : > { %351 = sbr.rel (!%p3779_p5) target bundleno = 90 (0x5a), region = 52  ;;  %s352_s16 = sand.u32 (%p3779_p5), 1, %s3666_s11  }
  0x37   : > { %s2421_s26 = sshll.u32 (%p3779_p5), %s3670_s12, 2  ;;  %s2420_s1 = sshll.u32 (%p3779_p5), %s352_s16, 6 }
  0x38   : > { %s358_s15 = ssub.s32 (%p3779_p5), 9, %s2421_s26  ;;  %s3850_s24 = scalar_lea.sflag (%p3779_p5), [#allocation3], %s352_s16 }
  0x39   : > { %p359_p3 = scmp.lt.s32.totalorder (%p3779_p5), %s358_s15, 4  ;;  %s356_s17 = scalar_lea.vmem (%p3779_p5), [#allocation2], %s2420_s1 }
  0x3b   : > { %s4378_s15 = smov (!%p359_p3, %s358_s15), 4 }
  0x3c   : > { %s3087_s18 = sshll.u32 %s4378_s15, 4 }
  0x3d   : > { %s363_s28 = ssub.s32 64, %s3087_s18 }
  0x3e   : > { %s364_s29 = sshll.u32 %s363_s28, 4 }
  0x3f   : > { %365 = vsyncadd %s3850_s24, %s364_s29  ;;  %p3853_p5 = scmp.ne.s32.totalorder %s3087_s18, 0  ;;  %s3089_s25 = sshll.u32 %s3670_s12, 6 }
  0x40   : > { %s369_s27 = scalar_lea.hbm %s4326_s0, %s3089_s25  ;;  %s3861_s9 = sshll.u32 %s356_s17, 4  ;;  %s374_s9 = int_to_ptr.vmem [resolvable:$true] %s3861_s9 }
  0x41   : > { %s371_s30 = sshll.u32 %s369_s27, 4  ;;  %s2428_s22 = sshll.u32 %s4378_s15, 8  ;;  %s3864_s30 = int_to_ptr.hbm [resolvable:$true] %s371_s30 }
  0x42   : > { %s3542_s14 = sshra.s32 %s3864_s30, 4  ;;  %s3544_s16 = sshrl.u32 %s2428_s22, 4  ;;  %s3543_s14 = int_to_ptr.hbm [resolvable:$true] %s3542_s14 }
  0x43   : > { %s3549_s26 = scalar_lea.hbm %s3543_s14, %s3544_s16  ;;  %s3553_s28 = scalar_lea.hbm %s4326_s0, 144 }
  0x44   : > { %p3550_p7 = scmp.ne.s32.totalorder %s3543_s14, %s3549_s26  ;;  %p3554_p10 = scmp.lt.s32.totalorder %s3543_s14, %s4326_s0 }
  0x45   : > { %p3555_p1 = scmp.lt.s32.totalorder %s3553_s28, %s3549_s26 }
  0x46   : > { %p3551_p8 = pnand %p3550_p7, %p3853_p5 }
  0x47   : > { %p3556_p0 = por %p3555_p1, %p3554_p10 }
  0x48   : > { %p3552_p9 = pneg %p3551_p8 }
  0x4a   : > { %p3557_p2 = pnand %p3556_p0, %p3552_p9 }
  0x4c   : > { %3560 = shalt.err (!%p3557_p2)
}
  0x4d   : > { %s3561_s25 = sshra.s32 %s374_s9, 4  ;;  %s3684_s21 = smov [#allocation2]   ;;  %s3562_s25 = int_to_ptr.vmem [resolvable:$true] %s3561_s25 }
  0x4e   : > { %s3568_s3 = scalar_lea.vmem %s3562_s25, %s3544_s16  ;;  %s3572_s27 = scalar_lea.vmem %s3684_s21, 128 }
  0x4f   : > { %p3569_p3 = scmp.ne.s32.totalorder %s3562_s25, %s3568_s3  ;;  %p3574_p4 = scmp.lt.s32.totalorder %s3572_s27, %s3568_s3 }
  0x51   : > { %p3570_p7 = pnand %p3569_p3, %p3853_p5 }
  0x53   : > { %p3571_p8 = pneg %p3570_p7 }
  0x55   : > { %p3576_p12 = pnand %p3574_p4, %p3571_p8 }
  0x57   : > { %3579 = shalt.err (!%p3576_p12)
}
  0x58   : > { %s3685_s14 = smov 256   ;;  %s3686_s26 = smov 16  }
  0x59   : > { %379 = dma.hbm_to_vmem [thread:$0]  (%p3853_p5), %s3864_s30, %s2428_s22, %s374_s9, %s3850_s24, %s3685_s14, %s3685_s14, %s3686_s26  }
  0x5a PF: > { %385 = sbr.rel (%p3800_p13) target bundleno = 817 (0x331), region = 56  ;;  %s3893_s16 = sand.u32 (!%p3800_p13), 1, %s3662_s10  }
  0x5b   : > { %s2430_s1 = sshll.u32 (!%p3800_p13), %s3893_s16, 6  ;;  %s388_s18 = scalar_lea.sflag (!%p3800_p13), [#allocation3], %s3893_s16 }
  0x5c   : > { %s3897_s28 = scalar_lea.vmem (!%p3800_p13), [#allocation2], %s2430_s1 }
  0x5f   : > { %3637 = dma.done.wait (%p3785_p6), %s388_s18, 1024  }
  0x60   : > { %3639 = vsyncadd (%p3785_p6), %s388_s18, 4294966272  ;;  %p4360_p4 = scmp.eq.s32.totalorder %s3761_s13, 0 }
  0x62   : > { %3641 = dma.done.wait (%p4360_p4), [#allocation6], 8256   ;;  %p4361_p12 = pmov %p4360_p4 }
  0x63   : > { %p4362_p13 = pmov %p4360_p4 }
  0x64   : > { %3643 = vsyncadd (%p4361_p12), [#allocation6], 4294959040 }
  0x65   : > { %3645 = dma.done.wait (%p4362_p13), [#allocation9], 4160   ;;  %p4363_p5 = pmov %p4360_p4 }
  0x66   : > { %p4364_p9 = pmov %p4360_p4 }
  0x67   : > { %3647 = vsyncadd (%p4363_p5), [#allocation9], 4294963136 }
  0x68   : > { %3649 = dma.done.wait (%p4364_p9), [#allocation12], 8192   ;;  %p4365_p10 = pmov %p4360_p4 }
  0x69   : > { %v2552_v0 = vld [vmem:[#allocation5 + $0xe0] sm:$0xf]  ;;  %v3120_v1 = vld [vmem:[#allocation5 + $0xec] sm:$0xf0]  ;;  %v3118_v5 = vld [vmem:[#allocation5 + $0xe4] sm:$0xf] }
  0x6a   : > { %3651 = vsyncadd (%p4365_p10), [#allocation12], 4294959104  ;;  %v2680_v2 = vld [vmem:[#allocation5 + $0x1e0] sm:$0xf]  ;;  %v2553_v3 = vor.u32 %v3120_v1, %v2552_v0  ;;  %v3152_v4 = vld [vmem:[#allocation5 + $0x1ec] sm:$0xf0] }
  0x6b   : > { %v2554_v6 = vld [vmem:[#allocation5 + $0xf0] sm:$0xf0]  ;;  %v2681_v7 = vor.u32 %v3152_v4, %v2680_v2  ;;  %v3150_v9 = vld [vmem:[#allocation5 + $0x1e4] sm:$0xf]  ;;  %v2536_v11 = vld [vmem:[#allocation5 + $0xc0] sm:$0xf] }
  0x6c   : > { %v2557_v8 = vor.u32 %v3118_v5, %v2554_v6  ;;  %v2682_v10 = vld [vmem:[#allocation5 + $0x1f0] sm:$0xf0]  ;;  %874 = vmatpush.bf16.msra.mxu0 %v2553_v3  ;;  %v3116_v13 = vld [vmem:[#allocation5 + $0xcc] sm:$0xf0]  ;;  %v2664_v14 = vld [vmem:[#allocation5 + $0x1c0] sm:$0xf] }
  0x6d   : > { %v2685_v12 = vor.u32 %v3150_v9, %v2682_v10  ;;  %v3148_v15 = vld [vmem:[#allocation5 + $0x1cc] sm:$0xf0]  ;;  %893 = vmatpush.bf16.msra.mxu1 %v2681_v7  ;;  %v2537_v16 = vor.u32 %v3116_v13, %v2536_v11  ;;  %v3114_v18 = vld [vmem:[#allocation5 + $0xc4] sm:$0xf]  ;;  %v2538_v19 = vld [vmem:[#allocation5 + $0xd0] sm:$0xf0] }
  0x6e   : > { %912 = vmatpush.bf16.msra.mxu2 %v2557_v8  ;;  %v2665_v17 = vor.u32 %v3148_v15, %v2664_v14  ;;  %v3146_v20 = vld [vmem:[#allocation5 + $0x1c4] sm:$0xf]  ;;  %v2541_v21 = vor.u32 %v3114_v18, %v2538_v19  ;;  %v2666_v22 = vld [vmem:[#allocation5 + $0x1d0] sm:$0xf0]  ;;  %v2520_v23 = vld [vmem:[#allocation5 + $0xa0] sm:$0xf] }
  0x6f   : > { %931 = vmatpush.bf16.msra.mxu3 %v2685_v12  ;;  %v3112_v24 = vld [vmem:[#allocation5 + $0xac] sm:$0xf0]  ;;  %v2669_v25 = vor.u32 %v3146_v20, %v2666_v22  ;;  %v2648_v26 = vld [vmem:[#allocation5 + $0x1a0] sm:$0xf]  ;;  %v3110_v28 = vld [vmem:[#allocation5 + $0xa4] sm:$0xf] }
  0x70   : > { %v3144_v27 = vld [vmem:[#allocation5 + $0x1ac] sm:$0xf0]  ;;  %875 = vmatpush.bf16.msra.mxu0 %v2537_v16  ;;  %v2521_v29 = vor.u32 %v3112_v24, %v2520_v23  ;;  %v2522_v30 = vld [vmem:[#allocation5 + $0xb0] sm:$0xf0]  ;;  %v3142_v31 = vld [vmem:[#allocation5 + $0x1a4] sm:$0xf] }
  0x71   : > { %v2650_v32 = vld [vmem:[#allocation5 + $0x1b0] sm:$0xf0]  ;;  %894 = vmatpush.bf16.msra.mxu1 %v2665_v17  ;;  %v2649_v33 = vor.u32 %v3144_v27, %v2648_v26  ;;  %v2525_v34 = vor.u32 %v3110_v28, %v2522_v30  ;;  %v2504_v35 = vld [vmem:[#allocation5 + $0x80] sm:$0xf]  ;;  %v3108_v36 = vld [vmem:[#allocation5 + $0x8c] sm:$0xf0] }
  0x72   : > { %913 = vmatpush.bf16.msra.mxu2 %v2541_v21  ;;  %v2632_v37 = vld [vmem:[#allocation5 + $0x180] sm:$0xf]  ;;  %v2653_v38 = vor.u32 %v3142_v31, %v2650_v32  ;;  %v3140_v39 = vld [vmem:[#allocation5 + $0x18c] sm:$0xf0]  ;;  %v3106_v40 = vld [vmem:[#allocation5 + $0x84] sm:$0xf]  ;;  %v2505_v44 = vor.u32 %v3108_v36, %v2504_v35 }
  0x73   : > { %932 = vmatpush.bf16.msra.mxu3 %v2669_v25  ;;  %v2506_v41 = vld [vmem:[#allocation5 + $0x90] sm:$0xf0]  ;;  %v3138_v42 = vld [vmem:[#allocation5 + $0x184] sm:$0xf]  ;;  %v2633_v45 = vor.u32 %v3140_v39, %v2632_v37  ;;  %v2488_v47 = vld [vmem:[#allocation5 + $0x60] sm:$0xf] }
  0x74   : > { %v2634_v43 = vld [vmem:[#allocation5 + $0x190] sm:$0xf0]  ;;  %876 = vmatpush.bf16.msra.mxu0 %v2521_v29  ;;  %v2509_v46 = vor.u32 %v3106_v40, %v2506_v41  ;;  %v3104_v48 = vld [vmem:[#allocation5 + $0x6c] sm:$0xf0]  ;;  %v2616_v49 = vld [vmem:[#allocation5 + $0x160] sm:$0xf] }
  0x75   : > { %895 = vmatpush.bf16.msra.mxu1 %v2649_v33  ;;  %v2637_v50 = vor.u32 %v3138_v42, %v2634_v43  ;;  %v3136_v51 = vld [vmem:[#allocation5 + $0x16c] sm:$0xf0]  ;;  %v3102_v52 = vld [vmem:[#allocation5 + $0x64] sm:$0xf]  ;;  %v2490_v53 = vld [vmem:[#allocation5 + $0x70] sm:$0xf0]  ;;  %v2489_v56 = vor.u32 %v3104_v48, %v2488_v47 }
  0x76   : > { %914 = vmatpush.bf16.msra.mxu2 %v2525_v34  ;;  %v3134_v54 = vld [vmem:[#allocation5 + $0x164] sm:$0xf]  ;;  %v2618_v55 = vld [vmem:[#allocation5 + $0x170] sm:$0xf0]  ;;  %v2617_v57 = vor.u32 %v3136_v51, %v2616_v49  ;;  %v2493_v58 = vor.u32 %v3102_v52, %v2490_v53  ;;  %v2472_v59 = vld [vmem:[#allocation5 + $0x40] sm:$0xf] }
  0x77   : > { %933 = vmatpush.bf16.msra.mxu3 %v2653_v38  ;;  %v3100_v60 = vld [vmem:[#allocation5 + $0x4c] sm:$0xf0]  ;;  %v2600_v61 = vld [vmem:[#allocation5 + $0x140] sm:$0xf]  ;;  %v2621_v62 = vor.u32 %v3134_v54, %v2618_v55  ;;  %v3098_v0 = vld [vmem:[#allocation5 + $0x44] sm:$0xf] }
  0x78   : > { %877 = vmatpush.bf16.msra.mxu0 %v2505_v44  ;;  %v3132_v63 = vld [vmem:[#allocation5 + $0x14c] sm:$0xf0]  ;;  %v2474_v1 = vld [vmem:[#allocation5 + $0x50] sm:$0xf0]  ;;  %v3130_v2 = vld [vmem:[#allocation5 + $0x144] sm:$0xf]  ;;  %v2473_v4 = vor.u32 %v3100_v60, %v2472_v59 }
  0x79   : > { %896 = vmatpush.bf16.msra.mxu1 %v2633_v45  ;;  %v2602_v3 = vld [vmem:[#allocation5 + $0x150] sm:$0xf0]  ;;  %v2601_v5 = vor.u32 %v3132_v63, %v2600_v61  ;;  %v2477_v6 = vor.u32 %v3098_v0, %v2474_v1  ;;  %v2456_v7 = vld [vmem:[#allocation5 + $0x20] sm:$0xf]  ;;  %v3096_v8 = vld [vmem:[#allocation5 + $0x2c] sm:$0xf0] }
  0x7a   : > { %915 = vmatpush.bf16.msra.mxu2 %v2509_v46  ;;  %v2584_v9 = vld [vmem:[#allocation5 + $0x120] sm:$0xf]  ;;  %v2605_v10 = vor.u32 %v3130_v2, %v2602_v3  ;;  %v3128_v11 = vld [vmem:[#allocation5 + $0x12c] sm:$0xf0]  ;;  %v3094_v12 = vld [vmem:[#allocation5 + $0x24] sm:$0xf]  ;;  %v2457_v16 = vor.u32 %v3096_v8, %v2456_v7 }
  0x7b   : > { %934 = vmatpush.bf16.msra.mxu3 %v2637_v50  ;;  %v2458_v13 = vld [vmem:[#allocation5 + $0x30] sm:$0xf0]  ;;  %v3126_v14 = vld [vmem:[#allocation5 + $0x124] sm:$0xf]  ;;  %v2440_v17 = vld [vmem:[#allocation5] sm:$0xf]  ;;  %v2585_v19 = vor.u32 %v3128_v11, %v2584_v9 }
  0x7c   : > { %878 = vmatpush.bf16.msra.mxu0 %v2489_v56  ;;  %v2586_v15 = vld [vmem:[#allocation5 + $0x130] sm:$0xf0]  ;;  %v3092_v18 = vld [vmem:[#allocation5 + $0xc] sm:$0xf0]  ;;  %v2461_v20 = vor.u32 %v3094_v12, %v2458_v13  ;;  %v2568_v21 = vld [vmem:[#allocation5 + $0x100] sm:$0xf] }
  0x7d   : > { %897 = vmatpush.bf16.msra.mxu1 %v2617_v57  ;;  %v3124_v22 = vld [vmem:[#allocation5 + $0x10c] sm:$0xf0]  ;;  %v3090_v23 = vld [vmem:[#allocation5 + $0x4] sm:$0xf]  ;;  %v2589_v24 = vor.u32 %v3126_v14, %v2586_v15  ;;  %v2442_v25 = vld [vmem:[#allocation5 + $0x10] sm:$0xf0]  ;;  %v2441_v31 = vor.u32 %v3092_v18, %v2440_v17 }
  0x7e   : > { %916 = vmatpush.bf16.msra.mxu2 %v2493_v58  ;;  %v3122_v26 = vld [vmem:[#allocation5 + $0x104] sm:$0xf]  ;;  %v2570_v27 = vld [vmem:[#allocation5 + $0x110] sm:$0xf0]  ;;  %v3119_v29 = vld [vmem:[#allocation5 + $0xec] sm:$0xf]  ;;  %v2569_v35 = vor.u32 %v3124_v22, %v2568_v21  ;;  %v2445_v36 = vor.u32 %v3090_v23, %v2442_v25 }
  0x7f   : > { %935 = vmatpush.bf16.msra.mxu3 %v2621_v62  ;;  %v468_v28 = vld [vmem:[%s3897_s28] sm:$0xff]  ;;  %v2562_v30 = vld [vmem:[#allocation5 + $0xf8] sm:$0xf0]  ;;  %v470_v32 = vld [vmem:[%s3897_s28 + $0x10] sm:$0xff]  ;;  %v2573_v39 = vor.u32 %v3122_v26, %v2570_v27  ;;  %s2437_s19 = sshll.u32 %s3893_s16, 5  ;;  %s2259_s30 = scalar_lea.sflag [#allocation4], %s3893_s16 }
  0x80   : > { %879 = vmatpush.bf16.msra.mxu0 %v2473_v4  ;;  %v2688_v33 = vld [vmem:[#allocation5 + $0x1e8] sm:$0xf]  ;;  %v3153_v34 = vld [vmem:[#allocation5 + $0x1f4] sm:$0xf0]  ;;  %v2565_v40 = vor.u32 %v3119_v29, %v2562_v30  ;;  %v3151_v43 = vld [vmem:[#allocation5 + $0x1ec] sm:$0xf]  ;;  %v3919_v44 = vpack.c.bf16 %v470_v32, %v468_v28 }
  0x81   : > { %898 = vmatpush.bf16.msra.mxu1 %v2601_v5  ;;  %v469_v37 = vld [vmem:[%s3897_s28 + $0x8] sm:$0xff]  ;;  %v471_v38 = vld [vmem:[%s3897_s28 + $0x18] sm:$0xff]  ;;  %v2689_v45 = vor.u32 %v3153_v34, %v2688_v33  ;;  %v474_v23 = vld [vmem:[%s3897_s28 + $0x30] sm:$0xff]  ;;  %s4258_s9 = scalar_lea.vmem [#allocation14], %s2437_s19  ;;  %s3079_s29 = sshll.u32 (%p3792_p11), %s3761_s13, 2 }
  0x82   : > { %917 = vmatpush.bf16.msra.mxu2 %v2477_v6  ;;  %v2560_v41 = vld [vmem:[#allocation5 + $0xe8] sm:$0xf]  ;;  %v3121_v42 = vld [vmem:[#allocation5 + $0xf4] sm:$0xf0]  ;;  %v2690_v46 = vld [vmem:[#allocation5 + $0x1f8] sm:$0xf0]  ;;  %v3921_v49 = vpack.c.bf16 %v471_v38, %v469_v37 }
  0x83   : > { %936 = vmatpush.bf16.msra.mxu3 %v2605_v10  ;;  %v3115_v47 = vld [vmem:[#allocation5 + $0xcc] sm:$0xf]  ;;  %v2546_v48 = vld [vmem:[#allocation5 + $0xd8] sm:$0xf0]  ;;  %v2672_v50 = vld [vmem:[#allocation5 + $0x1c8] sm:$0xf]  ;;  %v2561_v52 = vor.u32 %v3121_v42, %v2560_v41  ;;  %v2693_v53 = vor.u32 %v3151_v43, %v2690_v46 }
  0x84   : > { %880 = vmatpush.bf16.msra.mxu0 %v2457_v16  ;;  %v3149_v51 = vld [vmem:[#allocation5 + $0x1d4] sm:$0xf0]  ;;  %v2549_v54 = vor.u32 %v3115_v47, %v2546_v48  ;;  %v2544_v55 = vld [vmem:[#allocation5 + $0xc8] sm:$0xf]  ;;  %v3147_v57 = vld [vmem:[#allocation5 + $0x1cc] sm:$0xf] }
  0x85   : > { %899 = vmatpush.bf16.msra.mxu1 %v2585_v19  ;;  %v3117_v56 = vld [vmem:[#allocation5 + $0xd4] sm:$0xf0]  ;;  %v2673_v58 = vor.u32 %v3149_v51, %v2672_v50  ;;  %v2674_v59 = vld [vmem:[#allocation5 + $0x1d8] sm:$0xf0]  ;;  %v3111_v60 = vld [vmem:[#allocation5 + $0xac] sm:$0xf] }
  0x86   : > { %918 = vmatpush.bf16.msra.mxu2 %v2461_v20  ;;  %v2530_v61 = vld [vmem:[#allocation5 + $0xb8] sm:$0xf0]  ;;  %v2656_v62 = vld [vmem:[#allocation5 + $0x1a8] sm:$0xf]  ;;  %v3145_v63 = vld [vmem:[#allocation5 + $0x1b4] sm:$0xf0]  ;;  %v2545_v0 = vor.u32 %v3117_v56, %v2544_v55  ;;  %v2677_v1 = vor.u32 %v3147_v57, %v2674_v59 }
  0x87   : > { %937 = vmatpush.bf16.msra.mxu3 %v2589_v24  ;;  %v2533_v2 = vor.u32 %v3111_v60, %v2530_v61  ;;  %v2528_v3 = vld [vmem:[#allocation5 + $0xa8] sm:$0xf]  ;;  %v3113_v4 = vld [vmem:[#allocation5 + $0xb4] sm:$0xf0]  ;;  %v3143_v5 = vld [vmem:[#allocation5 + $0x1ac] sm:$0xf]  ;;  %v2657_v6 = vor.u32 %v3145_v63, %v2656_v62 }
  0x88   : > { %881 = vmatpush.bf16.msra.mxu0 %v2441_v31  ;;  %v2658_v7 = vld [vmem:[#allocation5 + $0x1b8] sm:$0xf0]  ;;  %v3107_v8 = vld [vmem:[#allocation5 + $0x8c] sm:$0xf]  ;;  %v2640_v10 = vld [vmem:[#allocation5 + $0x188] sm:$0xf]  ;;  %v2529_v12 = vor.u32 %v3113_v4, %v2528_v3 }
  0x89   : > { %900 = vmatpush.bf16.msra.mxu1 %v2569_v35  ;;  %v2514_v9 = vld [vmem:[#allocation5 + $0x98] sm:$0xf0]  ;;  %v3141_v11 = vld [vmem:[#allocation5 + $0x194] sm:$0xf0]  ;;  %v2512_v13 = vld [vmem:[#allocation5 + $0x88] sm:$0xf]  ;;  %v2661_v14 = vor.u32 %v3143_v5, %v2658_v7 }
  0x8a   : > { %919 = vmatpush.bf16.msra.mxu2 %v2445_v36  ;;  %v2517_v15 = vor.u32 %v3107_v8, %v2514_v9  ;;  %v3109_v16 = vld [vmem:[#allocation5 + $0x94] sm:$0xf0]  ;;  %v3139_v17 = vld [vmem:[#allocation5 + $0x18c] sm:$0xf]  ;;  %v2642_v18 = vld [vmem:[#allocation5 + $0x198] sm:$0xf0]  ;;  %v2641_v19 = vor.u32 %v3141_v11, %v2640_v10 }
  0x8b   : > { %938 = vmatpush.bf16.msra.mxu3 %v2573_v39  ;;  %882 = vmatmul.bf16.vlgmr.msra.gmra.mxu0 %v3919_v44  ;;  %v472_v20 = vld [vmem:[%s3897_s28 + $0x20] sm:$0xff]  ;;  %v3103_v21 = vld [vmem:[#allocation5 + $0x6c] sm:$0xf]  ;;  %v2498_v22 = vld [vmem:[#allocation5 + $0x78] sm:$0xf0]  ;;  %v2513_v26 = vor.u32 %v3109_v16, %v2512_v13  ;;  %v2645_v30 = vor.u32 %v3139_v17, %v2642_v18  ;;  %s2267_s17 = ssub.s32 (%p3792_p11), 9, %s3079_s29 }
  0x8c   : > { %901 = vmatmul.bf16.vlgmr.msra.gmra.mxu1 %v3921_v49  ;;  %950 = vmatpush.bf16.msrb.mxu0 %v2561_v52  ;;  %v2624_v24 = vld [vmem:[#allocation5 + $0x168] sm:$0xf]  ;;  %v3137_v25 = vld [vmem:[#allocation5 + $0x174] sm:$0xf0]  ;;  %v2501_v31 = vor.u32 %v3103_v21, %v2498_v22  ;;  %v3135_v33 = vld [vmem:[#allocation5 + $0x16c] sm:$0xf]  ;;  %v3931_v34 = vpack.c.bf16 %v474_v23, %v472_v20 }
  0x8d   : > { %969 = vmatpush.bf16.msrb.mxu1 %v2689_v45  ;;  %920 = vmatmul.bf16.vlgmr.msra.gmra.mxu2 %v3919_v44  ;;  %v473_v27 = vld [vmem:[%s3897_s28 + $0x28] sm:$0xff]  ;;  %v475_v28 = vld [vmem:[%s3897_s28 + $0x38] sm:$0xff]  ;;  %v2625_v35 = vor.u32 %v3137_v25, %v2624_v24  ;;  %v2754_v5 = vld [vmem:[#allocation8 + $0x78] sm:$0xf0]  ;;  %p2268_p6 = scmp.lt.s32.totalorder (%p3792_p11), %s2267_s17, 4 }
  0x8e   : > { %988 = vmatpush.bf16.msrb.mxu2 %v2565_v40  ;;  %939 = vmatmul.bf16.vlgmr.msra.gmra.mxu3 %v3921_v49  ;;  %v2496_v29 = vld [vmem:[#allocation5 + $0x68] sm:$0xf]  ;;  %v3105_v32 = vld [vmem:[#allocation5 + $0x74] sm:$0xf0]  ;;  %v2626_v36 = vld [vmem:[#allocation5 + $0x178] sm:$0xf0]  ;;  %v3933_v39 = vpack.c.bf16 %v475_v28, %v473_v27 }
  0x8f   : > { %1007 = vmatpush.bf16.msrb.mxu3 %v2693_v53  ;;  %v3099_v37 = vld [vmem:[#allocation5 + $0x4c] sm:$0xf]  ;;  %v2482_v38 = vld [vmem:[#allocation5 + $0x58] sm:$0xf0]  ;;  %v2608_v40 = vld [vmem:[#allocation5 + $0x148] sm:$0xf]  ;;  %v2497_v42 = vor.u32 %v3105_v32, %v2496_v29  ;;  %v2629_v43 = vor.u32 %v3135_v33, %v2626_v36 }
  0x90   : > { %951 = vmatpush.bf16.msrb.mxu0 %v2545_v0  ;;  %v3133_v41 = vld [vmem:[#allocation5 + $0x154] sm:$0xf0]  ;;  %v2485_v45 = vor.u32 %v3099_v37, %v2482_v38  ;;  %v2480_v46 = vld [vmem:[#allocation5 + $0x48] sm:$0xf]  ;;  %v3131_v48 = vld [vmem:[#allocation5 + $0x14c] sm:$0xf] }
  0x91   : > { %970 = vmatpush.bf16.msrb.mxu1 %v2673_v58  ;;  %v3101_v47 = vld [vmem:[#allocation5 + $0x54] sm:$0xf0]  ;;  %v2609_v50 = vor.u32 %v3133_v41, %v2608_v40  ;;  %v2610_v51 = vld [vmem:[#allocation5 + $0x158] sm:$0xf0]  ;;  %v3095_v52 = vld [vmem:[#allocation5 + $0x2c] sm:$0xf] }
  0x92   : > { %989 = vmatpush.bf16.msrb.mxu2 %v2549_v54  ;;  %v2466_v53 = vld [vmem:[#allocation5 + $0x38] sm:$0xf0]  ;;  %v2592_v54 = vld [vmem:[#allocation5 + $0x128] sm:$0xf]  ;;  %v3129_v55 = vld [vmem:[#allocation5 + $0x134] sm:$0xf0]  ;;  %v2481_v56 = vor.u32 %v3101_v47, %v2480_v46  ;;  %v2613_v58 = vor.u32 %v3131_v48, %v2610_v51 }
  0x93   : > { %1008 = vmatpush.bf16.msrb.mxu3 %v2677_v1  ;;  %v2464_v57 = vld [vmem:[#allocation5 + $0x28] sm:$0xf]  ;;  %v2469_v59 = vor.u32 %v3095_v52, %v2466_v53  ;;  %v3097_v60 = vld [vmem:[#allocation5 + $0x34] sm:$0xf0]  ;;  %v3127_v61 = vld [vmem:[#allocation5 + $0x12c] sm:$0xf]  ;;  %v2593_v63 = vor.u32 %v3129_v55, %v2592_v54 }
  0x94   : > { %952 = vmatpush.bf16.msrb.mxu0 %v2529_v12  ;;  %v2594_v62 = vld [vmem:[#allocation5 + $0x138] sm:$0xf0]  ;;  %v3091_v0 = vld [vmem:[#allocation5 + $0xc] sm:$0xf]  ;;  %v3125_v3 = vld [vmem:[#allocation5 + $0x114] sm:$0xf0] }
  0x95   : > { %971 = vmatpush.bf16.msrb.mxu1 %v2657_v6  ;;  %v2450_v1 = vld [vmem:[#allocation5 + $0x18] sm:$0xf0]  ;;  %v3168_v4 = vld [vmem:[#allocation8 + $0x74] sm:$0xf]  ;;  %v2465_v6 = vor.u32 %v3097_v60, %v2464_v57  ;;  %v2448_v7 = vld [vmem:[#allocation5 + $0x8] sm:$0xf]  ;;  %v2597_v10 = vor.u32 %v3127_v61, %v2594_v62 }
  0x96   : > { %990 = vmatpush.bf16.msrb.mxu2 %v2533_v2  ;;  %v2576_v2 = vld [vmem:[#allocation5 + $0x108] sm:$0xf]  ;;  %v2816_v8 = vld [vmem:[#allocation8 + $0xf0] sm:$0xf]  ;;  %v3185_v9 = vld [vmem:[#allocation8 + $0xf4] sm:$0xf0]  ;;  %v2453_v11 = vor.u32 %v3091_v0, %v2450_v1  ;;  %v3939_v16 = vor.u32 %v3168_v4, %v2754_v5 }
  0x97   : > { %1009 = vmatpush.bf16.msrb.mxu3 %v2661_v14  ;;  %v3093_v12 = vld [vmem:[#allocation5 + $0x14] sm:$0xf0]  ;;  %v3123_v13 = vld [vmem:[#allocation5 + $0x10c] sm:$0xf]  ;;  %v2578_v14 = vld [vmem:[#allocation5 + $0x118] sm:$0xf0]  ;;  %v3941_v21 = vor.u32 %v3185_v9, %v2816_v8 }
  0x98   : > { %953 = vmatpush.bf16.msrb.mxu0 %v2513_v26  ;;  %v3184_v17 = vld [vmem:[#allocation8 + $0xf4] sm:$0xf]  ;;  %v2752_v18 = vld [vmem:[#allocation8 + $0x70] sm:$0xf]  ;;  %v2818_v20 = vld [vmem:[#allocation8 + $0xf8] sm:$0xf0]  ;;  %v2449_v24 = vor.u32 %v3093_v12, %v2448_v7  ;;  %v2581_v25 = vor.u32 %v3123_v13, %v2578_v14 }
  0x99   : > { %972 = vmatpush.bf16.msrb.mxu1 %v2641_v19  ;;  %v3169_v19 = vld [vmem:[#allocation8 + $0x74] sm:$0xf0]  ;;  %v3166_v22 = vld [vmem:[#allocation8 + $0x64] sm:$0xf]  ;;  %v2746_v23 = vld [vmem:[#allocation8 + $0x68] sm:$0xf0]  ;;  %v3946_v27 = vor.u32 %v3184_v17, %v2818_v20 }
  0x9a   : > { %991 = vmatpush.bf16.msrb.mxu2 %v2517_v15  ;;  %v2577_v15 = vor.u32 %v3125_v3, %v2576_v2  ;;  %v3943_v26 = vor.u32 %v3169_v19, %v2752_v18  ;;  %v3948_v28 = vor.u32 %v3166_v22, %v2746_v23  ;;  %v3182_v29 = vld [vmem:[#allocation8 + $0xe4] sm:$0xf]  ;;  %v2744_v32 = vld [vmem:[#allocation8 + $0x60] sm:$0xf]  ;;  %v3167_v33 = vld [vmem:[#allocation8 + $0x64] sm:$0xf0] }
  0x9b   : > { %1010 = vmatpush.bf16.msrb.mxu3 %v2645_v30  ;;  %887 = vmatmul.bf16.gmra.mxu0 %v3931_v34  ;;  %v2810_v30 = vld [vmem:[#allocation8 + $0xe8] sm:$0xf0]  ;;  %v3965_v36 = vor.u32 %v3167_v33, %v2744_v32  ;;  %v3183_v37 = vld [vmem:[#allocation8 + $0xe4] sm:$0xf0]  ;;  %v3180_v40 = vld [vmem:[#allocation8 + $0xd4] sm:$0xf] }
  0x9c   : > { %906 = vmatmul.bf16.gmra.mxu1 %v3933_v39  ;;  %954 = vmatpush.bf16.msrb.mxu0 %v2497_v42  ;;  %v2736_v42 = vld [vmem:[#allocation8 + $0x50] sm:$0xf]  ;;  %v3181_v47 = vld [vmem:[#allocation8 + $0xd4] sm:$0xf0]  ;;  %v2730_v51 = vld [vmem:[#allocation8 + $0x48] sm:$0xf0] }
  0x9d   : > { %973 = vmatpush.bf16.msrb.mxu1 %v2625_v35  ;;  %925 = vmatmul.bf16.gmra.mxu2 %v3931_v34  ;;  %v2808_v35 = vld [vmem:[#allocation8 + $0xe0] sm:$0xf]  ;;  %v2800_v46 = vld [vmem:[#allocation8 + $0xd0] sm:$0xf]  ;;  %v3178_v52 = vld [vmem:[#allocation8 + $0xc4] sm:$0xf] }
  0x9e   : > { %992 = vmatpush.bf16.msrb.mxu2 %v2501_v31  ;;  %944 = vmatmul.bf16.gmra.mxu3 %v3933_v39  ;;  %v3954_v31 = vor.u32 %v3182_v29, %v2810_v30  ;;  %v3967_v38 = vor.u32 %v3183_v37, %v2808_v35  ;;  %v3978_v48 = vor.u32 %v3181_v47, %v2800_v46  ;;  %v2794_v54 = vld [vmem:[#allocation8 + $0xc8] sm:$0xf0]  ;;  %v2728_v55 = vld [vmem:[#allocation8 + $0x40] sm:$0xf]  ;;  %v3179_v60 = vld [vmem:[#allocation8 + $0xc4] sm:$0xf0] }
  0x9f   : > { %1011 = vmatpush.bf16.msrb.mxu3 %v2629_v43  ;;  %v3985_v57 = vor.u32 %v3178_v52, %v2794_v54  ;;  %v3160_v62 = vld [vmem:[#allocation8 + $0x34] sm:$0xf]  ;;  %v2786_v2 = vld [vmem:[#allocation8 + $0xb8] sm:$0xf0]  ;;  %v2720_v3 = vld [vmem:[#allocation8 + $0x30] sm:$0xf] }
  0xa0   : > { %955 = vmatpush.bf16.msrb.mxu0 %v2481_v56  ;;  %v3163_v56 = vld [vmem:[#allocation8 + $0x44] sm:$0xf0]  ;;  %v3176_v0 = vld [vmem:[#allocation8 + $0xb4] sm:$0xf]  ;;  %v3161_v4 = vld [vmem:[#allocation8 + $0x34] sm:$0xf0] }
  0xa1   : > { %974 = vmatpush.bf16.msrb.mxu1 %v2609_v50  ;;  %v3162_v50 = vld [vmem:[#allocation8 + $0x44] sm:$0xf]  ;;  %v3997_v5 = vor.u32 %v3176_v0, %v2786_v2  ;;  %v2784_v7 = vld [vmem:[#allocation8 + $0xb0] sm:$0xf]  ;;  %v3177_v8 = vld [vmem:[#allocation8 + $0xb4] sm:$0xf0] }
  0xa2   : > { %993 = vmatpush.bf16.msrb.mxu2 %v2485_v45  ;;  %v3983_v53 = vor.u32 %v3162_v50, %v2730_v51  ;;  %v4002_v9 = vor.u32 %v3177_v8, %v2784_v7  ;;  %v3174_v12 = vld [vmem:[#allocation8 + $0xa4] sm:$0xf]  ;;  %v2778_v14 = vld [vmem:[#allocation8 + $0xa8] sm:$0xf0]  ;;  %v3159_v17 = vld [vmem:[#allocation8 + $0x24] sm:$0xf0] }
  0xa3   : > { %1012 = vmatpush.bf16.msrb.mxu3 %v2613_v58  ;;  %v3987_v58 = vor.u32 %v3163_v56, %v2728_v55  ;;  %v4009_v18 = vor.u32 %v3174_v12, %v2778_v14  ;;  %v2776_v20 = vld [vmem:[#allocation8 + $0xa0] sm:$0xf]  ;;  %v3175_v22 = vld [vmem:[#allocation8 + $0xa4] sm:$0xf0]  ;;  %v3172_v29 = vld [vmem:[#allocation8 + $0x94] sm:$0xf] }
  0xa4   : > { %956 = vmatpush.bf16.msrb.mxu0 %v2465_v6  ;;  %v3999_v6 = vor.u32 %v3161_v4, %v2720_v3  ;;  %v4014_v23 = vor.u32 %v3175_v22, %v2776_v20  ;;  %v2770_v32 = vld [vmem:[#allocation8 + $0x98] sm:$0xf0]  ;;  %v2704_v33 = vld [vmem:[#allocation8 + $0x10] sm:$0xf]  ;;  %v3157_v35 = vld [vmem:[#allocation8 + $0x14] sm:$0xf0] }
  0xa5   : > { %975 = vmatpush.bf16.msrb.mxu1 %v2593_v63  ;;  %v2722_v63 = vld [vmem:[#allocation8 + $0x38] sm:$0xf0]  ;;  %v4021_v37 = vor.u32 %v3172_v29, %v2770_v32  ;;  %v3170_v46 = vld [vmem:[#allocation8 + $0x84] sm:$0xf]  ;;  %v2762_v50 = vld [vmem:[#allocation8 + $0x88] sm:$0xf0] }
  0xa6   : > { %994 = vmatpush.bf16.msrb.mxu2 %v2469_v59  ;;  %v2792_v59 = vld [vmem:[#allocation8 + $0xc0] sm:$0xf]  ;;  %v3995_v1 = vor.u32 %v3160_v62, %v2722_v63  ;;  %v3155_v52 = vld [vmem:[#allocation8 + $0x4] sm:$0xf0]  ;;  %v4033_v54 = vor.u32 %v3170_v46, %v2762_v50  ;;  %v4047_v62 = vld [vmem:[#allocation7] sm:$0xf] }
  0xa7   : > { %1013 = vmatpush.bf16.msrb.mxu3 %v2597_v10  ;;  %v3990_v61 = vor.u32 %v3179_v60, %v2792_v59  ;;  %v3158_v10 = vld [vmem:[#allocation8 + $0x24] sm:$0xf]  ;;  %v2696_v51 = vld [vmem:[#allocation8] sm:$0xf]  ;;  %v3171_v59 = vld [vmem:[#allocation8 + $0x84] sm:$0xf0] }
  0xa8   : > { %957 = vmatpush.bf16.msrb.mxu0 %v2449_v24  ;;  %v3156_v24 = vld [vmem:[#allocation8 + $0x14] sm:$0xf]  ;;  %v4035_v55 = vor.u32 %v3155_v52, %v2696_v51  ;;  %v2760_v56 = vld [vmem:[#allocation8 + $0x80] sm:$0xf] }
  0xa9   : > { %976 = vmatpush.bf16.msrb.mxu1 %v2577_v15  ;;  %v2712_v15 = vld [vmem:[#allocation8 + $0x20] sm:$0xf]  ;;  %v4038_v60 = vor.u32 %v3171_v59, %v2760_v56 }
  0xaa   : > { %995 = vmatpush.bf16.msrb.mxu2 %v2453_v11  ;;  %v2714_v11 = vld [vmem:[#allocation8 + $0x28] sm:$0xf0]  ;;  %v4011_v19 = vor.u32 %v3159_v17, %v2712_v15 }
  0xab   : > { %1014 = vmatpush.bf16.msrb.mxu3 %v2581_v25  ;;  %958 = vmatmul.bf16.vlgmr.msrb.gmra.mxu0 %v3919_v44  ;;  %v4007_v13 = vor.u32 %v3158_v10, %v2714_v11  ;;  %v2706_v25 = vld [vmem:[#allocation8 + $0x18] sm:$0xf0] }
  0xac   : > { %1263 = vmatpush.bf16.msra.mxu0 %v3943_v26  ;;  %977 = vmatmul.bf16.vlgmr.msrb.gmra.mxu1 %v3921_v49  ;;  %v4019_v30 = vor.u32 %v3156_v24, %v2706_v25 }
  0xad   : > { %1282 = vmatpush.bf16.msra.mxu1 %v3941_v21  ;;  %996 = vmatmul.bf16.vlgmr.msrb.gmra.mxu2 %v3919_v44  ;;  %v3164_v44 = vld [vmem:[#allocation8 + $0x54] sm:$0xf] }
  0xae   : > { %1301 = vmatpush.bf16.msra.mxu2 %v3939_v16  ;;  %1015 = vmatmul.bf16.vlgmr.msrb.gmra.mxu3 %v3921_v49  ;;  %v2738_v49 = vld [vmem:[#allocation8 + $0x58] sm:$0xf0] }
  0xaf   : > { %1320 = vmatpush.bf16.msra.mxu3 %v3946_v27  ;;  %v3971_v41 = vor.u32 %v3164_v44, %v2738_v49  ;;  %v4023_v44 = vor.u32 %v3157_v35, %v2704_v33  ;;  %v2768_v49 = vld [vmem:[#allocation8 + $0x90] sm:$0xf] }
  0xb0   : > { %1264 = vmatpush.bf16.msra.mxu0 %v3965_v36 }
  0xb1   : > { %1283 = vmatpush.bf16.msra.mxu1 %v3967_v38 }
  0xb2   : > { %1302 = vmatpush.bf16.msra.mxu2 %v3948_v28 }
  0xb3   : > { %1321 = vmatpush.bf16.msra.mxu3 %v3954_v31 }
  0xb5   : > { %1284 = vmatpush.bf16.msra.mxu1 %v3978_v48 }
  0xb6   : > { %1303 = vmatpush.bf16.msra.mxu2 %v3971_v41 }
  0xb9   : > { %1285 = vmatpush.bf16.msra.mxu1 %v3990_v61 }
  0xba   : > { %1304 = vmatpush.bf16.msra.mxu2 %v3983_v53 }
  0xbb   : > { %963 = vmatmul.bf16.gmra.mxu0 %v3931_v34 }
  0xbc   : > { %982 = vmatmul.bf16.gmra.mxu1 %v3933_v39 }
  0xbd   : > { %1001 = vmatmul.bf16.gmra.mxu2 %v3931_v34  ;;  %v2802_v34 = vld [vmem:[#allocation8 + $0xd8] sm:$0xf0]  ;;  %1286 = vmatpush.bf16.msra.mxu1 %v4002_v9 }
  0xbe   : > { %1020 = vmatmul.bf16.gmra.mxu3 %v3933_v39  ;;  %v3165_v39 = vld [vmem:[#allocation8 + $0x54] sm:$0xf0]  ;;  %v3973_v43 = vor.u32 %v3180_v40, %v2802_v34  ;;  %1305 = vmatpush.bf16.msra.mxu2 %v3995_v1 }
  0xbf   : > { %v3975_v45 = vor.u32 %v3165_v39, %v2736_v42  ;;  %v3173_v40 = vld [vmem:[#allocation8 + $0x94] sm:$0xf0]  ;;  %v3154_v42 = vld [vmem:[#allocation8 + $0x4] sm:$0xf]  ;;  %v2698_v39 = vld [vmem:[#allocation8 + $0x8] sm:$0xf0] }
  0xc0   : > { %1322 = vmatpush.bf16.msra.mxu3 %v3973_v43  ;;  %v4026_v34 = vor.u32 %v3173_v40, %v2768_v49  ;;  %v4031_v47 = vor.u32 %v3154_v42, %v2698_v39  ;;  %v4086_v40 = vperm.slane %v4047_v62, 2 }
  0xc1   : > { %1265 = vmatpush.bf16.msra.mxu0 %v3975_v45  ;;  %1287 = vmatpush.bf16.msra.mxu1 %v4014_v23 }
  0xc2   : > { %1306 = vmatpush.bf16.msra.mxu2 %v4007_v13 }
  0xc4   : > { %1323 = vmatpush.bf16.msra.mxu3 %v3985_v57 }
  0xc5   : > { %1266 = vmatpush.bf16.msra.mxu0 %v3987_v58  ;;  %1288 = vmatpush.bf16.msra.mxu1 %v4026_v34 }
  0xc6   : > { %1307 = vmatpush.bf16.msra.mxu2 %v4019_v30 }
  0xc8   : > { %1324 = vmatpush.bf16.msra.mxu3 %v3997_v5 }
  0xc9   : > { %1267 = vmatpush.bf16.msra.mxu0 %v3999_v6  ;;  %1289 = vmatpush.bf16.msra.mxu1 %v4038_v60 }
  0xca   : > { %1308 = vmatpush.bf16.msra.mxu2 %v4031_v47 }
  0xcc   : > { %1325 = vmatpush.bf16.msra.mxu3 %v4009_v18 }
  0xcd   : > { %1268 = vmatpush.bf16.msra.mxu0 %v4011_v19  ;;  %1378 = vmatpush.bf16.msrb.mxu1 %v3941_v21 }
  0xce   : > { %1397 = vmatpush.bf16.msrb.mxu2 %v3939_v16  ;;  %v546_v16 = vperm.slane %v4047_v62, 0 }
  0xd0   : > { %1326 = vmatpush.bf16.msra.mxu3 %v4021_v37 }
  0xd1   : > { %1269 = vmatpush.bf16.msra.mxu0 %v4023_v44  ;;  %1379 = vmatpush.bf16.msrb.mxu1 %v3967_v38 }
  0xd2   : > { %1398 = vmatpush.bf16.msrb.mxu2 %v3948_v28 }
  0xd4   : > { %1327 = vmatpush.bf16.msra.mxu3 %v4033_v54 }
  0xd5   : > { %1270 = vmatpush.bf16.msra.mxu0 %v4035_v55  ;;  %1380 = vmatpush.bf16.msrb.mxu1 %v3978_v48 }
  0xd6   : > { %1399 = vmatpush.bf16.msrb.mxu2 %v3971_v41 }
  0xd8   : > { %1416 = vmatpush.bf16.msrb.mxu3 %v3946_v27  ;;  %v4055_v27 = vperm.slane %v4047_v62, 1 }
  0xd9   : > { %1359 = vmatpush.bf16.msrb.mxu0 %v3943_v26  ;;  %1381 = vmatpush.bf16.msrb.mxu1 %v3990_v61 }
  0xda   : > { %1400 = vmatpush.bf16.msrb.mxu2 %v3983_v53 }
  0xdc   : > { %1417 = vmatpush.bf16.msrb.mxu3 %v3954_v31 }
  0xdd   : > { %1360 = vmatpush.bf16.msrb.mxu0 %v3965_v36  ;;  %1382 = vmatpush.bf16.msrb.mxu1 %v4002_v9 }
  0xde   : > { %1401 = vmatpush.bf16.msrb.mxu2 %v3995_v1 }
  0xe0   : > { %1418 = vmatpush.bf16.msrb.mxu3 %v3973_v43 }
  0xe1   : > { %1361 = vmatpush.bf16.msrb.mxu0 %v3975_v45  ;;  %1383 = vmatpush.bf16.msrb.mxu1 %v4014_v23 }
  0xe2   : > { %1402 = vmatpush.bf16.msrb.mxu2 %v4007_v13 }
  0xe4   : > { %1419 = vmatpush.bf16.msrb.mxu3 %v3985_v57 }
  0xe5   : > { %1362 = vmatpush.bf16.msrb.mxu0 %v3987_v58  ;;  %1384 = vmatpush.bf16.msrb.mxu1 %v4026_v34 }
  0xe6   : > { %1403 = vmatpush.bf16.msrb.mxu2 %v4019_v30 }
  0xe8   : > { %1420 = vmatpush.bf16.msrb.mxu3 %v3997_v5 }
  0xe9   : > { %1363 = vmatpush.bf16.msrb.mxu0 %v3999_v6  ;;  %1385 = vmatpush.bf16.msrb.mxu1 %v4038_v60 }
  0xea   : > { %1404 = vmatpush.bf16.msrb.mxu2 %v4031_v47  ;;  %v4089_v47 = vperm.slane %v4047_v62, 3 }
  0xec   : > { %1421 = vmatpush.bf16.msrb.mxu3 %v4009_v18 }
  0xed   : > { %1364 = vmatpush.bf16.msrb.mxu0 %v4011_v19 }
  0xf0   : > { %1422 = vmatpush.bf16.msrb.mxu3 %v4021_v37 }
  0xf1   : > { %1365 = vmatpush.bf16.msrb.mxu0 %v4023_v44 }
  0xf4   : > { %1423 = vmatpush.bf16.msrb.mxu3 %v4033_v54 }
  0xf5   : > { %1366 = vmatpush.bf16.msrb.mxu0 %v4035_v55 }
 0x108   : > { %v883_v63 = vpop.f32.mrf.mxu0 }
 0x109   : > { %v902_v0 = vpop.f32.mrf.mxu1  ;;  %v884_v21 = vadd.f32 %v883_v63, %v546_v16 }
 0x10b   : > { %v903_v41 = vadd.f32 %v902_v0, %v884_v21 }
 0x10d   : > { %v1026_v48 = vmax.f32 %v903_v41, 0.0  ;;  %v2882_v41 = vld [vmem:[#allocation11 + $0x78] sm:$0xf0] }
 0x110   : > { %v921_v26 = vpop.f32.mrf.mxu2  ;;  %v885_v36 = vpop.f32.mrf.mxu0 }
 0x111   : > { %v922_v28 = vadd.f32 %v921_v26, %v4055_v27  ;;  %v940_v31 = vpop.f32.mrf.mxu3  ;;  %v904_v38 = vpop.f32.mrf.mxu1  ;;  %v886_v45 = vadd.f32 %v885_v36, %v546_v16 }
 0x113   : > { %v941_v43 = vadd.f32 %v940_v31, %v922_v28  ;;  %v905_v3 = vadd.f32 %v904_v38, %v886_v45  ;;  %v3200_v38 = vld [vmem:[#allocation11 + $0x74] sm:$0xf] }
 0x114   : > { %v3216_v45 = vld [vmem:[#allocation11 + $0xf4] sm:$0xf] }
 0x115   : > { %v1027_v53 = vmax.f32 %v941_v43, 0.0  ;;  %v1030_v6 = vmax.f32 %v905_v3, 0.0  ;;  %v4094_v43 = vor.u32 %v3200_v38, %v2882_v41  ;;  %v2936_v38 = vld [vmem:[#allocation11 + $0xe0] sm:$0xf]  ;;  %v3215_v41 = vld [vmem:[#allocation11 + $0xe4] sm:$0xf0] }
 0x117   : > { %v1042_v5 = vpack.c.bf16 %v1027_v53, %v1026_v48  ;;  %v2946_v48 = vld [vmem:[#allocation11 + $0xf8] sm:$0xf0]  ;;  %v2880_v53 = vld [vmem:[#allocation11 + $0x70] sm:$0xf] }
 0x118   : > { %v923_v2 = vpop.f32.mrf.mxu2  ;;  %v888_v4 = vpop.f32.mrf.mxu0 }
 0x119   : > { %v924_v57 = vadd.f32 %v923_v2, %v4055_v27  ;;  %v942_v58 = vpop.f32.mrf.mxu3  ;;  %v907_v61 = vpop.f32.mrf.mxu1  ;;  %v1087_v9 = vunpack.c.l.b16 %v1042_v5  ;;  %v1088_v10 = vunpack.c.h.b16 %v1042_v5  ;;  %v889_v14 = vadd.f32 %v888_v4, %v546_v16  ;;  %v2944_v4 = vld [vmem:[#allocation11 + $0xf0] sm:$0xf] }
 0x11b   : > { %v943_v1 = vadd.f32 %v942_v58, %v924_v57  ;;  %v908_v23 = vadd.f32 %v907_v61, %v889_v14  ;;  %v4096_v57 = vor.u32 %v3216_v45, %v2946_v48  ;;  %v3201_v58 = vld [vmem:[#allocation11 + $0x74] sm:$0xf0]  ;;  %v4119_v45 = vor.u32 %v3215_v41, %v2936_v38  ;;  %v3196_v48 = vld [vmem:[#allocation11 + $0x54] sm:$0xf] }
 0x11c   : > { %v3217_v61 = vld [vmem:[#allocation11 + $0xf4] sm:$0xf0] }
 0x11d   : > { %v1031_v7 = vmax.f32 %v943_v1, 0.0  ;;  %v1034_v30 = vmax.f32 %v908_v23, 0.0  ;;  %v3189_v38 = vld [vmem:[#allocation11 + $0x14] sm:$0xf0] }
 0x11f   : > { %v1044_v8 = vpack.c.bf16 %v1031_v7, %v1030_v6  ;;  %v4100_v7 = vor.u32 %v3201_v58, %v2880_v53  ;;  %v2866_v53 = vld [vmem:[#allocation11 + $0x58] sm:$0xf0] }
 0x120   : > { %v926_v11 = vpop.f32.mrf.mxu2  ;;  %v890_v18 = vpop.f32.mrf.mxu0  ;;  %v2930_v58 = vld [vmem:[#allocation11 + $0xd8] sm:$0xf0] }
 0x121   : > { %v1089_v12 = vunpack.c.l.b16 %v1044_v8  ;;  %v1090_v13 = vunpack.c.h.b16 %v1044_v8  ;;  %v927_v15 = vadd.f32 %v926_v11, %v4055_v27  ;;  %v945_v17 = vpop.f32.mrf.mxu3  ;;  %v909_v19 = vpop.f32.mrf.mxu1  ;;  %v891_v25 = vadd.f32 %v890_v18, %v546_v16  ;;  %v3198_v8 = vld [vmem:[#allocation11 + $0x64] sm:$0xf] }
 0x122   : > { %v4103_v11 = vor.u32 %v3217_v61, %v2944_v4  ;;  %v2864_v4 = vld [vmem:[#allocation11 + $0x50] sm:$0xf]  ;;  %v3197_v61 = vld [vmem:[#allocation11 + $0x54] sm:$0xf0] }
 0x123   : > { %v1095_v20 = vpack.c.b16 %v1089_v12, %v1087_v9  ;;  %v1096_v22 = vpack.c.b16 %v1090_v13, %v1088_v10  ;;  %v946_v24 = vadd.f32 %v945_v17, %v927_v15  ;;  %v910_v33 = vadd.f32 %v909_v19, %v891_v25  ;;  %v2874_v9 = vld [vmem:[#allocation11 + $0x68] sm:$0xf0]  ;;  %v3214_v10 = vld [vmem:[#allocation11 + $0xe4] sm:$0xf] }
 0x124   : > { %v4105_v12 = vor.u32 %v3198_v8, %v2874_v9  ;;  %v2938_v13 = vld [vmem:[#allocation11 + $0xe8] sm:$0xf0]  ;;  %v3213_v8 = vld [vmem:[#allocation11 + $0xd4] sm:$0xf0] }
 0x125   : > { %1271 = vmatmul.bf16.vlgmr.msra.gmra.mxu0 %v1095_v20  ;;  %1290 = vmatmul.bf16.vlgmr.msra.gmra.mxu1 %v1096_v22  ;;  %v1035_v32 = vmax.f32 %v946_v24, 0.0  ;;  %v1038_v39 = vmax.f32 %v910_v33, 0.0  ;;  %v4108_v15 = vor.u32 %v3214_v10, %v2938_v13  ;;  %v3194_v10 = vld [vmem:[#allocation11 + $0x44] sm:$0xf]  ;;  %v2858_v13 = vld [vmem:[#allocation11 + $0x48] sm:$0xf0] }
 0x126   : > { %1309 = vmatmul.bf16.vlgmr.msra.gmra.mxu2 %v1095_v20  ;;  %1328 = vmatmul.bf16.vlgmr.msra.gmra.mxu3 %v1096_v22 }
 0x127   : > { %v1046_v42 = vpack.c.bf16 %v1035_v32, %v1034_v30  ;;  %1735 = vmatpush.bf16.msra.mxu2 %v4094_v43  ;;  %1754 = vmatpush.bf16.msra.mxu3 %v4096_v57 }
 0x128   : > { %v928_v29 = vpop.f32.mrf.mxu2  ;;  %v959_v44 = vpop.f32.mrf.mxu0  ;;  %1697 = vmatpush.bf16.msra.mxu0 %v4100_v7  ;;  %1716 = vmatpush.bf16.msra.mxu1 %v4103_v11 }
 0x129   : > { %v929_v35 = vadd.f32 %v928_v29, %v4055_v27  ;;  %v947_v37 = vpop.f32.mrf.mxu3  ;;  %v978_v34 = vpop.f32.mrf.mxu1  ;;  %v960_v51 = vadd.f32 %v959_v44, %v4086_v40  ;;  %v1091_v55 = vunpack.c.l.b16 %v1046_v42  ;;  %v1092_v59 = vunpack.c.h.b16 %v1046_v42 }
 0x12b   : > { %v948_v49 = vadd.f32 %v947_v37, %v929_v35  ;;  %v979_v16 = vadd.f32 %v978_v34, %v960_v51  ;;  %1736 = vmatpush.bf16.msra.mxu2 %v4105_v12  ;;  %1755 = vmatpush.bf16.msra.mxu3 %v4108_v15 }
 0x12c   : > { %1717 = vmatpush.bf16.msra.mxu1 %v4119_v45 }
 0x12d   : > { %v1039_v46 = vmax.f32 %v948_v49, 0.0  ;;  %v1028_v31 = vmax.f32 %v979_v16, 0.0 }
 0x12f   : > { %v1048_v50 = vpack.c.bf16 %v1039_v46, %v1038_v39 }
 0x130   : > { %v997_v52 = vpop.f32.mrf.mxu2  ;;  %v961_v0 = vpop.f32.mrf.mxu0 }
 0x131   : > { %v1016_v54 = vpop.f32.mrf.mxu3  ;;  %v1093_v56 = vunpack.c.l.b16 %v1048_v50  ;;  %v1094_v60 = vunpack.c.h.b16 %v1048_v50  ;;  %v998_v63 = vadd.f32 %v997_v52, %v4089_v47  ;;  %v980_v28 = vpop.f32.mrf.mxu1  ;;  %v962_v62 = vadd.f32 %v961_v0, %v4086_v40 }
 0x133   : > { %v1097_v27 = vpack.c.b16 %v1093_v56, %v1091_v55  ;;  %v1098_v21 = vpack.c.b16 %v1094_v60, %v1092_v59  ;;  %v1017_v26 = vadd.f32 %v1016_v54, %v998_v63  ;;  %v981_v1 = vadd.f32 %v980_v28, %v962_v62 }
 0x135   : > { %1276 = vmatmul.bf16.gmra.mxu0 %v1097_v27  ;;  %1295 = vmatmul.bf16.gmra.mxu1 %v1098_v21  ;;  %v1029_v36 = vmax.f32 %v1017_v26, 0.0  ;;  %v1032_v18 = vmax.f32 %v981_v1, 0.0 }
 0x136   : > { %1314 = vmatmul.bf16.gmra.mxu2 %v1097_v27  ;;  %1333 = vmatmul.bf16.gmra.mxu3 %v1098_v21 }
 0x137   : > { %v1043_v17 = vpack.c.bf16 %v1029_v36, %v1028_v31  ;;  %v2872_v31 = vld [vmem:[#allocation11 + $0x60] sm:$0xf]  ;;  %v3199_v36 = vld [vmem:[#allocation11 + $0x64] sm:$0xf0] }
 0x138   : > { %v999_v2 = vpop.f32.mrf.mxu2  ;;  %v964_v6 = vpop.f32.mrf.mxu0 }
 0x139   : > { %v1018_v3 = vpop.f32.mrf.mxu3  ;;  %v1000_v5 = vadd.f32 %v999_v2, %v4089_v47  ;;  %v983_v20 = vpop.f32.mrf.mxu1  ;;  %v1343_v23 = vunpack.c.l.b16 %v1043_v17  ;;  %v1344_v24 = vunpack.c.h.b16 %v1043_v17  ;;  %v965_v33 = vadd.f32 %v964_v6, %v4086_v40  ;;  %v3212_v2 = vld [vmem:[#allocation11 + $0xd4] sm:$0xf]  ;;  %v2928_v6 = vld [vmem:[#allocation11 + $0xd0] sm:$0xf] }
 0x13a   : > { %v4125_v1 = vor.u32 %v3212_v2, %v2930_v58  ;;  %v4130_v9 = vor.u32 %v3213_v8, %v2928_v6  ;;  %v4135_v17 = vor.u32 %v3194_v10, %v2858_v13  ;;  %v3205_v2 = vld [vmem:[#allocation11 + $0x94] sm:$0xf0]  ;;  %v3202_v6 = vld [vmem:[#allocation11 + $0x84] sm:$0xf]  ;;  %v2890_v10 = vld [vmem:[#allocation11 + $0x88] sm:$0xf0] }
 0x13b   : > { %v1019_v14 = vadd.f32 %v1018_v3, %v1000_v5  ;;  %v984_v34 = vadd.f32 %v983_v20, %v965_v33  ;;  %v4123_v3 = vor.u32 %v3196_v48, %v2866_v53  ;;  %v4127_v5 = vor.u32 %v3197_v61, %v2864_v4  ;;  %v3208_v33 = vld [vmem:[#allocation11 + $0xb4] sm:$0xf]  ;;  %v2896_v53 = vld [vmem:[#allocation11 + $0x90] sm:$0xf]  ;;  %v3186_v4 = vld [vmem:[#allocation11 + $0x4] sm:$0xf] }
 0x13c   : > { %1756 = vmatpush.bf16.msra.mxu3 %v4125_v1  ;;  %1718 = vmatpush.bf16.msra.mxu1 %v4130_v9  ;;  %v4178_v58 = vor.u32 %v3205_v2, %v2896_v53  ;;  %v2826_v61 = vld [vmem:[#allocation11 + $0x8] sm:$0xf0]  ;;  %v2824_v13 = vld [vmem:[#allocation11] sm:$0xf] }
 0x13d   : > { %v1033_v19 = vmax.f32 %v1019_v14, 0.0  ;;  %v1036_v51 = vmax.f32 %v984_v34, 0.0  ;;  %1737 = vmatpush.bf16.msra.mxu2 %v4123_v3  ;;  %v3210_v14 = vld [vmem:[#allocation11 + $0xc4] sm:$0xf]  ;;  %v4183_v8 = vor.u32 %v3186_v4, %v2826_v61 }
 0x13f   : > { %v1045_v22 = vpack.c.bf16 %v1033_v19, %v1032_v18  ;;  %v2922_v18 = vld [vmem:[#allocation11 + $0xc8] sm:$0xf0]  ;;  %v2856_v19 = vld [vmem:[#allocation11 + $0x40] sm:$0xf] }
 0x140   : > { %v1002_v25 = vpop.f32.mrf.mxu2  ;;  %v966_v37 = vpop.f32.mrf.mxu0  ;;  %v4137_v20 = vor.u32 %v3210_v14, %v2922_v18  ;;  %v3187_v14 = vld [vmem:[#allocation11 + $0x4] sm:$0xf0]  ;;  %v4185_v18 = vor.u32 %v3202_v6, %v2890_v10 }
 0x141   : > { %v1021_v29 = vpop.f32.mrf.mxu3  ;;  %v1345_v30 = vunpack.c.l.b16 %v1045_v22  ;;  %v1346_v32 = vunpack.c.h.b16 %v1045_v22  ;;  %v1003_v35 = vadd.f32 %v1002_v25, %v4089_v47  ;;  %v967_v39 = vadd.f32 %v966_v37, %v4086_v40  ;;  %v985_v46 = vpop.f32.mrf.mxu1  ;;  %v3195_v22 = vld [vmem:[#allocation11 + $0x44] sm:$0xf0]  ;;  %1738 = vmatpush.bf16.msra.mxu2 %v4135_v17  ;;  %v2914_v37 = vld [vmem:[#allocation11 + $0xb8] sm:$0xf0] }
 0x142   : > { %v4140_v25 = vor.u32 %v3195_v22, %v2856_v19  ;;  %1757 = vmatpush.bf16.msra.mxu3 %v4137_v20  ;;  %v4149_v34 = vor.u32 %v3208_v33, %v2914_v37  ;;  %v4187_v19 = vor.u32 %v3187_v14, %v2824_v13  ;;  %v2888_v22 = vld [vmem:[#allocation11 + $0x80] sm:$0xf] }
 0x143   : > { %v1351_v44 = vpack.c.b16 %v1345_v30, %v1343_v23  ;;  %v1352_v49 = vpack.c.b16 %v1346_v32, %v1344_v24  ;;  %v1022_v42 = vadd.f32 %v1021_v29, %v1003_v35  ;;  %v986_v54 = vadd.f32 %v985_v46, %v967_v39  ;;  %v2920_v23 = vld [vmem:[#allocation11 + $0xc0] sm:$0xf]  ;;  %v3211_v24 = vld [vmem:[#allocation11 + $0xc4] sm:$0xf0]  ;;  %v3192_v30 = vld [vmem:[#allocation11 + $0x34] sm:$0xf] }
 0x144   : > { %v4142_v29 = vor.u32 %v3211_v24, %v2920_v23  ;;  %v2850_v32 = vld [vmem:[#allocation11 + $0x38] sm:$0xf0]  ;;  %v2912_v39 = vld [vmem:[#allocation11 + $0xb0] sm:$0xf]  ;;  %v3209_v46 = vld [vmem:[#allocation11 + $0xb4] sm:$0xf0] }
 0x145   : > { %1367 = vmatmul.bf16.vlgmr.msrb.gmra.mxu0 %v1351_v44  ;;  %1386 = vmatmul.bf16.vlgmr.msrb.gmra.mxu1 %v1352_v49  ;;  %v1037_v52 = vmax.f32 %v1022_v42, 0.0  ;;  %v1040_v63 = vmax.f32 %v986_v54, 0.0  ;;  %v4147_v35 = vor.u32 %v3192_v30, %v2850_v32  ;;  %v3206_v54 = vld [vmem:[#allocation11 + $0xa4] sm:$0xf]  ;;  %v3203_v23 = vld [vmem:[#allocation11 + $0x84] sm:$0xf0] }
 0x146   : > { %1405 = vmatmul.bf16.vlgmr.msrb.gmra.mxu2 %v1351_v44  ;;  %1424 = vmatmul.bf16.vlgmr.msrb.gmra.mxu3 %v1352_v49  ;;  %v2848_v44 = vld [vmem:[#allocation11 + $0x30] sm:$0xf]  ;;  %v3193_v49 = vld [vmem:[#allocation11 + $0x34] sm:$0xf0]  ;;  %v4190_v24 = vor.u32 %v3203_v23, %v2888_v22 }
 0x147   : > { %v1047_v60 = vpack.c.bf16 %v1037_v52, %v1036_v51  ;;  %1719 = vmatpush.bf16.msra.mxu1 %v4142_v29  ;;  %v4151_v42 = vor.u32 %v3193_v49, %v2848_v44  ;;  %1739 = vmatpush.bf16.msra.mxu2 %v4147_v35  ;;  %v3190_v51 = vld [vmem:[#allocation11 + $0x24] sm:$0xf]  ;;  %v2842_v52 = vld [vmem:[#allocation11 + $0x28] sm:$0xf0] }
 0x148   : > { %v1004_v50 = vpop.f32.mrf.mxu2  ;;  %1758 = vmatpush.bf16.msra.mxu3 %v4149_v34 }
 0x149   : > { %v1005_v55 = vadd.f32 %v1004_v50, %v4089_v47  ;;  %v1023_v56 = vpop.f32.mrf.mxu3  ;;  %v1347_v27 = vunpack.c.l.b16 %v1047_v60  ;;  %v1348_v40 = vunpack.c.h.b16 %v1047_v60  ;;  %v4117_v47 = vor.u32 %v3199_v36, %v2872_v31  ;;  %v3191_v60 = vld [vmem:[#allocation11 + $0x24] sm:$0xf0]  ;;  %v2898_v31 = vld [vmem:[#allocation11 + $0x98] sm:$0xf0]  ;;  %v2832_v36 = vld [vmem:[#allocation11 + $0x10] sm:$0xf] }
 0x14a   : > { %v4154_v50 = vor.u32 %v3209_v46, %v2912_v39  ;;  %v4175_v48 = vor.u32 %v3189_v38, %v2832_v36 }
 0x14b   : > { %v1024_v59 = vadd.f32 %v1023_v56, %v1005_v55  ;;  %1698 = vmatpush.bf16.msra.mxu0 %v4117_v47  ;;  %v4159_v55 = vor.u32 %v3190_v51, %v2842_v52  ;;  %v2906_v56 = vld [vmem:[#allocation11 + $0xa8] sm:$0xf0] }
 0x14c   : > { %1720 = vmatpush.bf16.msra.mxu1 %v4154_v50 }
 0x14d   : > { %v1041_v0 = vmax.f32 %v1024_v59, 0.0  ;;  %v2840_v59 = vld [vmem:[#allocation11 + $0x20] sm:$0xf]  ;;  %1740 = vmatpush.bf16.msra.mxu2 %v4159_v55 }
 0x14f   : > { %v1049_v16 = vpack.c.bf16 %v1041_v0, %v1040_v63  ;;  %1699 = vmatpush.bf16.msra.mxu0 %v4127_v5  ;;  %v4161_v63 = vor.u32 %v3206_v54, %v2906_v56  ;;  %v4163_v0 = vor.u32 %v3191_v60, %v2840_v59 }
 0x151   : > { %v1349_v21 = vunpack.c.l.b16 %v1049_v16  ;;  %v1350_v26 = vunpack.c.h.b16 %v1049_v16  ;;  %v2904_v16 = vld [vmem:[#allocation11 + $0xa0] sm:$0xf]  ;;  %1759 = vmatpush.bf16.msra.mxu3 %v4161_v63 }
 0x153   : > { %v1353_v28 = vpack.c.b16 %v1349_v21, %v1347_v27  ;;  %v1354_v62 = vpack.c.b16 %v1350_v26, %v1348_v40  ;;  %1700 = vmatpush.bf16.msra.mxu0 %v4140_v25  ;;  %v3207_v27 = vld [vmem:[#allocation11 + $0xa4] sm:$0xf0]  ;;  %v3188_v40 = vld [vmem:[#allocation11 + $0x14] sm:$0xf]  ;;  %v2834_v26 = vld [vmem:[#allocation11 + $0x18] sm:$0xf0] }
 0x154   : > { %v4166_v21 = vor.u32 %v3207_v27, %v2904_v16 }
 0x155   : > { %1372 = vmatmul.bf16.gmra.mxu0 %v1353_v28  ;;  %1391 = vmatmul.bf16.gmra.mxu1 %v1354_v62 }
 0x156   : > { %1410 = vmatmul.bf16.gmra.mxu2 %v1353_v28  ;;  %1429 = vmatmul.bf16.gmra.mxu3 %v1354_v62  ;;  %v3204_v28 = vld [vmem:[#allocation11 + $0x94] sm:$0xf]  ;;  %v4171_v62 = vor.u32 %v3188_v40, %v2834_v26 }
 0x157   : > { %1701 = vmatpush.bf16.msra.mxu0 %v4151_v42  ;;  %1721 = vmatpush.bf16.msra.mxu1 %v4166_v21  ;;  %v4173_v41 = vor.u32 %v3204_v28, %v2898_v31 }
 0x158   : > { %1741 = vmatpush.bf16.msra.mxu2 %v4171_v62 }
 0x159   : > { %1760 = vmatpush.bf16.msra.mxu3 %v4173_v41 }
 0x15b   : > { %1702 = vmatpush.bf16.msra.mxu0 %v4163_v0  ;;  %1722 = vmatpush.bf16.msra.mxu1 %v4178_v58 }
 0x15c   : > { %1742 = vmatpush.bf16.msra.mxu2 %v4183_v8 }
 0x15d   : > { %1761 = vmatpush.bf16.msra.mxu3 %v4185_v18 }
 0x15f   : > { %1703 = vmatpush.bf16.msra.mxu0 %v4175_v48  ;;  %1723 = vmatpush.bf16.msra.mxu1 %v4190_v24 }
 0x160   : > { %1831 = vmatpush.bf16.msrb.mxu2 %v4094_v43  ;;  %v4206_v43 = vld [vmem:[#allocation10] sm:$0xf] }
 0x161   : > { %1850 = vmatpush.bf16.msrb.mxu3 %v4096_v57 }
 0x163   : > { %1704 = vmatpush.bf16.msra.mxu0 %v4187_v19  ;;  %1812 = vmatpush.bf16.msrb.mxu1 %v4103_v11  ;;  %v4210_v11 = vperm.slane %v4206_v43, 1 }
 0x164   : > { %1832 = vmatpush.bf16.msrb.mxu2 %v4105_v12 }
 0x165   : > { %1851 = vmatpush.bf16.msrb.mxu3 %v4108_v15 }
 0x167   : > { %1793 = vmatpush.bf16.msrb.mxu0 %v4100_v7  ;;  %1813 = vmatpush.bf16.msrb.mxu1 %v4119_v45 }
 0x168   : > { %1833 = vmatpush.bf16.msrb.mxu2 %v4123_v3  ;;  %v1436_v3 = vperm.slane %v4206_v43, 0 }
 0x169   : > { %1852 = vmatpush.bf16.msrb.mxu3 %v4125_v1 }
 0x16b   : > { %1794 = vmatpush.bf16.msrb.mxu0 %v4117_v47  ;;  %1814 = vmatpush.bf16.msrb.mxu1 %v4130_v9 }
 0x16c   : > { %1834 = vmatpush.bf16.msrb.mxu2 %v4135_v17 }
 0x16d   : > { %1853 = vmatpush.bf16.msrb.mxu3 %v4137_v20 }
 0x16f   : > { %1795 = vmatpush.bf16.msrb.mxu0 %v4127_v5  ;;  %1815 = vmatpush.bf16.msrb.mxu1 %v4142_v29 }
 0x170   : > { %1835 = vmatpush.bf16.msrb.mxu2 %v4147_v35 }
 0x171   : > { %1854 = vmatpush.bf16.msrb.mxu3 %v4149_v34 }
 0x173   : > { %1796 = vmatpush.bf16.msrb.mxu0 %v4140_v25  ;;  %1816 = vmatpush.bf16.msrb.mxu1 %v4154_v50 }
 0x174   : > { %1836 = vmatpush.bf16.msrb.mxu2 %v4159_v55 }
 0x175   : > { %1855 = vmatpush.bf16.msrb.mxu3 %v4161_v63 }
 0x177   : > { %1797 = vmatpush.bf16.msrb.mxu0 %v4151_v42  ;;  %1817 = vmatpush.bf16.msrb.mxu1 %v4166_v21 }
 0x178   : > { %1837 = vmatpush.bf16.msrb.mxu2 %v4171_v62 }
 0x179   : > { %1856 = vmatpush.bf16.msrb.mxu3 %v4173_v41 }
 0x17b   : > { %1798 = vmatpush.bf16.msrb.mxu0 %v4163_v0  ;;  %1818 = vmatpush.bf16.msrb.mxu1 %v4178_v58 }
 0x17c   : > { %1838 = vmatpush.bf16.msrb.mxu2 %v4183_v8  ;;  %v4238_v8 = vperm.slane %v4206_v43, 3 }
 0x17d   : > { %1857 = vmatpush.bf16.msrb.mxu3 %v4185_v18 }
 0x17f   : > { %1799 = vmatpush.bf16.msrb.mxu0 %v4175_v48  ;;  %1819 = vmatpush.bf16.msrb.mxu1 %v4190_v24 }
 0x183   : > { %1800 = vmatpush.bf16.msrb.mxu0 %v4187_v19 }
 0x1a2   : > { %v1272_v30 = vpop.f32.mrf.mxu0  ;;  %v1291_v32 = vpop.f32.mrf.mxu1 }
 0x1a3   : > { %v1292_v45 = vadd.f32 %v1291_v32, %v1272_v30 }
 0x1a5   : > { %v1444_v9 = vadd.f32 %v1436_v3, %v1292_v45  ;;  %v3225_v45 = vld [vmem:[#allocation13 + $0x38] sm:$0xff] }
 0x1a7   : > { %v1460_v49 = vmax.f32 %v1444_v9, 0.0 }
 0x1a9   : > { %v1310_v57 = vpop.f32.mrf.mxu2  ;;  %v1329_v7 = vpop.f32.mrf.mxu3 }
 0x1aa   : > { %v1330_v12 = vadd.f32 %v1329_v7, %v1310_v57  ;;  %v1274_v15 = vpop.f32.mrf.mxu0  ;;  %v1293_v47 = vpop.f32.mrf.mxu1  ;;  %v1438_v57 = vperm.slane %v4206_v43, 2 }
 0x1ab   : > { %v1294_v5 = vadd.f32 %v1293_v47, %v1274_v15 }
 0x1ac   : > { %v1445_v1 = vadd.f32 %v4210_v11, %v1330_v12 }
 0x1ad   : > { %v1448_v20 = vadd.f32 %v1436_v3, %v1294_v5 }
 0x1ae   : > { %v1461_v17 = vmax.f32 %v1445_v1, 0.0 }
 0x1af   : > { %v1464_v42 = vmax.f32 %v1448_v20, 0.0 }
 0x1b0   : > { %v1476_v34 = vpack.c.bf16 %v1461_v17, %v1460_v49  ;;  %v3224_v17 = vld [vmem:[#allocation13 + $0x30] sm:$0xff] }
 0x1b1   : > { %v1312_v33 = vpop.f32.mrf.mxu2  ;;  %v1331_v37 = vpop.f32.mrf.mxu3 }
 0x1b2   : > { %v1332_v25 = vadd.f32 %v1331_v37, %v1312_v33  ;;  %v1277_v29 = vpop.f32.mrf.mxu0  ;;  %v1296_v44 = vpop.f32.mrf.mxu1  ;;  %v1521_v50 = vunpack.c.l.b16 %v1476_v34  ;;  %v1522_v54 = vunpack.c.h.b16 %v1476_v34  ;;  %v3232_v33 = vld [vmem:[#allocation13 + $0x70] sm:$0xff] }
 0x1b3   : > { %v1297_v0 = vadd.f32 %v1296_v44, %v1277_v29 }
 0x1b4   : > { %v1449_v35 = vadd.f32 %v4210_v11, %v1332_v25 }
 0x1b5   : > { %v1452_v26 = vadd.f32 %v1436_v3, %v1297_v0 }
 0x1b6   : > { %v1465_v39 = vmax.f32 %v1449_v35, 0.0  ;;  %v3223_v35 = vld [vmem:[#allocation13 + $0x28] sm:$0xff] }
 0x1b7   : > { %v1468_v53 = vmax.f32 %v1452_v26, 0.0 }
 0x1b8   : > { %v1478_v46 = vpack.c.bf16 %v1465_v39, %v1464_v42 }
 0x1b9   : > { %v1315_v51 = vpop.f32.mrf.mxu2  ;;  %v1334_v52 = vpop.f32.mrf.mxu3 }
 0x1ba   : > { %v1523_v55 = vunpack.c.l.b16 %v1478_v46  ;;  %v1524_v56 = vunpack.c.h.b16 %v1478_v46  ;;  %v1335_v59 = vadd.f32 %v1334_v52, %v1315_v51  ;;  %v1279_v60 = vpop.f32.mrf.mxu0  ;;  %v1298_v63 = vpop.f32.mrf.mxu1  ;;  %v3222_v52 = vld [vmem:[#allocation13 + $0x20] sm:$0xff] }
 0x1bb   : > { %v1299_v40 = vadd.f32 %v1298_v63, %v1279_v60 }
 0x1bc   : > { %v1529_v16 = vpack.c.b16 %v1523_v55, %v1521_v50  ;;  %v1530_v27 = vpack.c.b16 %v1524_v56, %v1522_v54  ;;  %v1453_v21 = vadd.f32 %v4210_v11, %v1335_v59 }
 0x1bd   : > { %v1456_v36 = vadd.f32 %v1436_v3, %v1299_v40  ;;  %v3233_v3 = vld [vmem:[#allocation13 + $0x78] sm:$0xff] }
 0x1be   : > { %1705 = vmatmul.bf16.vlgmr.msra.gmra.mxu0 %v1529_v16  ;;  %1724 = vmatmul.bf16.vlgmr.msra.gmra.mxu1 %v1530_v27  ;;  %v1469_v31 = vmax.f32 %v1453_v21, 0.0 }
 0x1bf   : > { %1743 = vmatmul.bf16.vlgmr.msra.gmra.mxu2 %v1529_v16  ;;  %1762 = vmatmul.bf16.vlgmr.msra.gmra.mxu3 %v1530_v27  ;;  %v1472_v4 = vmax.f32 %v1456_v36, 0.0 }
 0x1c0   : > { %v1480_v58 = vpack.c.bf16 %v1469_v31, %v1468_v53  ;;  %2178 = vmatpush.bf16.msra.mxu0 %v3225_v45  ;;  %2197 = vmatpush.bf16.msra.mxu1 %v3233_v3  ;;  %v3239_v45 = vld [vmem:[#allocation13 + $0xa8] sm:$0xff]  ;;  %v3248_v3 = vld [vmem:[#allocation13 + $0xf0] sm:$0xff] }
 0x1c1   : > { %v1317_v28 = vpop.f32.mrf.mxu2  ;;  %v1336_v62 = vpop.f32.mrf.mxu3 }
 0x1c2   : > { %v1337_v38 = vadd.f32 %v1336_v62, %v1317_v28  ;;  %v1368_v41 = vpop.f32.mrf.mxu0  ;;  %v1387_v48 = vpop.f32.mrf.mxu1  ;;  %v1525_v14 = vunpack.c.l.b16 %v1480_v58  ;;  %v1526_v19 = vunpack.c.h.b16 %v1480_v58 }
 0x1c3   : > { %v1388_v32 = vadd.f32 %v1387_v48, %v1368_v41 }
 0x1c4   : > { %v1457_v2 = vadd.f32 %v4210_v11, %v1337_v38  ;;  %2179 = vmatpush.bf16.msra.mxu0 %v3224_v17  ;;  %2198 = vmatpush.bf16.msra.mxu1 %v3232_v33  ;;  %v3247_v17 = vld [vmem:[#allocation13 + $0xe8] sm:$0xff]  ;;  %v4248_v33 = vld [vmem:[%s4332_s6] sm:$0xf] }
 0x1c5   : > { %v1446_v47 = vadd.f32 %v1438_v57, %v1388_v32  ;;  %v3228_v32 = vld [vmem:[#allocation13 + $0x50] sm:$0xff] }
 0x1c6   : > { %v1473_v61 = vmax.f32 %v1457_v2, 0.0 }
 0x1c7   : > { %v1462_v29 = vmax.f32 %v1446_v47, 0.0  ;;  %v3249_v47 = vld [vmem:[#allocation13 + $0xf8] sm:$0xff] }
 0x1c8   : > { %v1482_v6 = vpack.c.bf16 %v1473_v61, %v1472_v4  ;;  %2180 = vmatpush.bf16.msra.mxu0 %v3223_v35  ;;  %2235 = vmatpush.bf16.msra.mxu3 %v3249_v47 }
 0x1c9   : > { %v1406_v10 = vpop.f32.mrf.mxu2  ;;  %v1425_v13 = vpop.f32.mrf.mxu3 }
 0x1ca   : > { %v1527_v18 = vunpack.c.l.b16 %v1482_v6  ;;  %v1528_v22 = vunpack.c.h.b16 %v1482_v6  ;;  %v1426_v23 = vadd.f32 %v1425_v13, %v1406_v10  ;;  %v1370_v24 = vpop.f32.mrf.mxu0  ;;  %v1389_v30 = vpop.f32.mrf.mxu1 }
 0x1cb   : > { %v1390_v15 = vadd.f32 %v1389_v30, %v1370_v24  ;;  %v3229_v24 = vld [vmem:[#allocation13 + $0x58] sm:$0xff]  ;;  %v3219_v30 = vld [vmem:[#allocation13 + $0x8] sm:$0xff] }
 0x1cc   : > { %v1531_v7 = vpack.c.b16 %v1527_v18, %v1525_v14  ;;  %v1532_v11 = vpack.c.b16 %v1528_v22, %v1526_v19  ;;  %v1447_v12 = vadd.f32 %v4238_v8, %v1426_v23  ;;  %2181 = vmatpush.bf16.msra.mxu0 %v3222_v52  ;;  %v3231_v19 = vld [vmem:[#allocation13 + $0x68] sm:$0xff]  ;;  %v3221_v22 = vld [vmem:[#allocation13 + $0x18] sm:$0xff]  ;;  %v3230_v23 = vld [vmem:[#allocation13 + $0x60] sm:$0xff]  ;;  %2236 = vmatpush.bf16.msra.mxu3 %v3248_v3 }
 0x1cd   : > { %v1450_v43 = vadd.f32 %v1438_v57, %v1390_v15  ;;  %2199 = vmatpush.bf16.msra.mxu1 %v3231_v19  ;;  %v3240_v15 = vld [vmem:[#allocation13 + $0xb0] sm:$0xff] }
 0x1ce   : > { %1710 = vmatmul.bf16.gmra.mxu0 %v1531_v7  ;;  %1729 = vmatmul.bf16.gmra.mxu1 %v1532_v11  ;;  %v1463_v1 = vmax.f32 %v1447_v12, 0.0  ;;  %v3226_v12 = vld [vmem:[#allocation13 + $0x40] sm:$0xff] }
 0x1cf   : > { %1748 = vmatmul.bf16.gmra.mxu2 %v1531_v7  ;;  %1767 = vmatmul.bf16.gmra.mxu3 %v1532_v11  ;;  %v1466_v34 = vmax.f32 %v1450_v43, 0.0  ;;  %v3227_v7 = vld [vmem:[#allocation13 + $0x48] sm:$0xff]  ;;  %v3241_v11 = vld [vmem:[#allocation13 + $0xb8] sm:$0xff] }
 0x1d0   : > { %v1477_v49 = vpack.c.bf16 %v1463_v1, %v1462_v29  ;;  %2182 = vmatpush.bf16.msra.mxu0 %v3221_v22  ;;  %2216 = vmatpush.bf16.msra.mxu2 %v3241_v11  ;;  %v3238_v1 = vld [vmem:[#allocation13 + $0xa0] sm:$0xff]  ;;  %v3237_v43 = vld [vmem:[#allocation13 + $0x98] sm:$0xff]  ;;  %v3236_v29 = vld [vmem:[#allocation13 + $0x90] sm:$0xff] }
 0x1d1   : > { %v1408_v5 = vpop.f32.mrf.mxu2  ;;  %v1427_v9 = vpop.f32.mrf.mxu3  ;;  %2200 = vmatpush.bf16.msra.mxu1 %v3230_v23  ;;  %2237 = vmatpush.bf16.msra.mxu3 %v3247_v17 }
 0x1d2   : > { %v1428_v37 = vadd.f32 %v1427_v9, %v1408_v5  ;;  %v1373_v20 = vpop.f32.mrf.mxu0  ;;  %v1392_v25 = vpop.f32.mrf.mxu1  ;;  %v1777_v46 = vunpack.c.l.b16 %v1477_v49  ;;  %v1778_v54 = vunpack.c.h.b16 %v1477_v49 }
 0x1d3   : > { %v1393_v0 = vadd.f32 %v1392_v25, %v1373_v20  ;;  %v1870_v25 = vperm.slane %v4248_v33, 0 }
 0x1d4   : > { %v1451_v44 = vadd.f32 %v4238_v8, %v1428_v37  ;;  %2217 = vmatpush.bf16.msra.mxu2 %v3240_v15  ;;  %v3246_v37 = vld [vmem:[#allocation13 + $0xe0] sm:$0xff]  ;;  %v1872_v15 = vperm.slane %v4248_v33, 2 }
 0x1d5   : > { %v1454_v26 = vadd.f32 %v1438_v57, %v1393_v0  ;;  %2201 = vmatpush.bf16.msra.mxu1 %v3229_v24  ;;  %2238 = vmatpush.bf16.msra.mxu3 %v3246_v37 }
 0x1d6   : > { %v1467_v42 = vmax.f32 %v1451_v44, 0.0 }
 0x1d7   : > { %v1470_v41 = vmax.f32 %v1454_v26, 0.0 }
 0x1d8   : > { %v1479_v39 = vpack.c.bf16 %v1467_v42, %v1466_v34  ;;  %2218 = vmatpush.bf16.msra.mxu2 %v3239_v45  ;;  %v3245_v42 = vld [vmem:[#allocation13 + $0xd8] sm:$0xff] }
 0x1d9   : > { %v1411_v50 = vpop.f32.mrf.mxu2  ;;  %v1430_v51 = vpop.f32.mrf.mxu3  ;;  %2202 = vmatpush.bf16.msra.mxu1 %v3228_v32  ;;  %2239 = vmatpush.bf16.msra.mxu3 %v3245_v42 }
 0x1da   : > { %v1779_v55 = vunpack.c.l.b16 %v1479_v39  ;;  %v1780_v56 = vunpack.c.h.b16 %v1479_v39  ;;  %v1431_v59 = vadd.f32 %v1430_v51, %v1411_v50  ;;  %v1375_v60 = vpop.f32.mrf.mxu0  ;;  %v1394_v63 = vpop.f32.mrf.mxu1  ;;  %v3235_v50 = vld [vmem:[#allocation13 + $0x88] sm:$0xff] }
 0x1db   : > { %v1395_v40 = vadd.f32 %v1394_v63, %v1375_v60  ;;  %v3234_v60 = vld [vmem:[#allocation13 + $0x80] sm:$0xff] }
 0x1dc   : > { %v1785_v16 = vpack.c.b16 %v1779_v55, %v1777_v46  ;;  %v1786_v27 = vpack.c.b16 %v1780_v56, %v1778_v54  ;;  %v1455_v21 = vadd.f32 %v4238_v8, %v1431_v59  ;;  %2219 = vmatpush.bf16.msra.mxu2 %v3238_v1  ;;  %v1871_v54 = vperm.slane %v4248_v33, 1  ;;  %v3244_v55 = vld [vmem:[#allocation13 + $0xd0] sm:$0xff] }
 0x1dd   : > { %v1458_v36 = vadd.f32 %v1438_v57, %v1395_v40  ;;  %v3218_v57 = vld [vmem:[#allocation13] sm:$0xff]  ;;  %2203 = vmatpush.bf16.msra.mxu1 %v3227_v7  ;;  %2240 = vmatpush.bf16.msra.mxu3 %v3244_v55 }
 0x1de   : > { %1801 = vmatmul.bf16.vlgmr.msrb.gmra.mxu0 %v1785_v16  ;;  %1820 = vmatmul.bf16.vlgmr.msrb.gmra.mxu1 %v1786_v27  ;;  %v1471_v31 = vmax.f32 %v1455_v21, 0.0 }
 0x1df   : > { %1839 = vmatmul.bf16.vlgmr.msrb.gmra.mxu2 %v1785_v16  ;;  %1858 = vmatmul.bf16.vlgmr.msrb.gmra.mxu3 %v1786_v27  ;;  %v1474_v2 = vmax.f32 %v1458_v36, 0.0 }
 0x1e0   : > { %v1481_v53 = vpack.c.bf16 %v1471_v31, %v1470_v41  ;;  %2220 = vmatpush.bf16.msra.mxu2 %v3237_v43 }
 0x1e1   : > { %v1413_v28 = vpop.f32.mrf.mxu2  ;;  %v1432_v62 = vpop.f32.mrf.mxu3  ;;  %2204 = vmatpush.bf16.msra.mxu1 %v3226_v12 }
 0x1e2   : > { %v1433_v38 = vadd.f32 %v1432_v62, %v1413_v28  ;;  %v1781_v61 = vunpack.c.l.b16 %v1481_v53  ;;  %v1782_v10 = vunpack.c.h.b16 %v1481_v53  ;;  %v3243_v28 = vld [vmem:[#allocation13 + $0xc8] sm:$0xff] }
 0x1e3   : > { %2241 = vmatpush.bf16.msra.mxu3 %v3243_v28 }
 0x1e4   : > { %v1459_v48 = vadd.f32 %v4238_v8, %v1433_v38  ;;  %v3220_v8 = vld [vmem:[#allocation13 + $0x10] sm:$0xff]  ;;  %2221 = vmatpush.bf16.msra.mxu2 %v3236_v29  ;;  %v3242_v38 = vld [vmem:[#allocation13 + $0xc0] sm:$0xff] }
 0x1e5   : > { %2183 = vmatpush.bf16.msra.mxu0 %v3220_v8 }
 0x1e6   : > { %v1475_v58 = vmax.f32 %v1459_v48, 0.0 }
 0x1e7   : > { %2242 = vmatpush.bf16.msra.mxu3 %v3242_v38 }
 0x1e8   : > { %v1483_v4 = vpack.c.bf16 %v1475_v58, %v1474_v2  ;;  %2222 = vmatpush.bf16.msra.mxu2 %v3235_v50 }
 0x1e9   : > { %2184 = vmatpush.bf16.msra.mxu0 %v3219_v30 }
 0x1ea   : > { %v1783_v6 = vunpack.c.l.b16 %v1483_v4  ;;  %v1784_v13 = vunpack.c.h.b16 %v1483_v4 }
 0x1ec   : > { %v1787_v14 = vpack.c.b16 %v1783_v6, %v1781_v61  ;;  %v1788_v18 = vpack.c.b16 %v1784_v13, %v1782_v10  ;;  %2223 = vmatpush.bf16.msra.mxu2 %v3234_v60 }
 0x1ed   : > { %2185 = vmatpush.bf16.msra.mxu0 %v3218_v57 }
 0x1ee   : > { %1806 = vmatmul.bf16.gmra.mxu0 %v1787_v14  ;;  %1825 = vmatmul.bf16.gmra.mxu1 %v1788_v18 }
 0x1ef   : > { %1844 = vmatmul.bf16.gmra.mxu2 %v1787_v14  ;;  %1863 = vmatmul.bf16.gmra.mxu3 %v1788_v18 }
 0x23b   : > { %v1706_v5 = vpop.f32.mrf.mxu0  ;;  %v1725_v9 = vpop.f32.mrf.mxu1 }
 0x23c   : > { %v1726_v20 = vadd.f32 %v1725_v9, %v1706_v5 }
 0x23e   : > { %v1878_v39 = vadd.f32 %v1870_v25, %v1726_v20  ;;  %v1873_v20 = vperm.slane %v4248_v33, 3 }
 0x240   : > { %v1894_v56 = vmax.f32 %v1878_v39, 0.0 }
 0x242   : > { %v1744_v44 = vpop.f32.mrf.mxu2  ;;  %v1763_v49 = vpop.f32.mrf.mxu3 }
 0x243   : > { %v1708_v35 = vpop.f32.mrf.mxu0  ;;  %v1727_v34 = vpop.f32.mrf.mxu1  ;;  %v1764_v52 = vadd.f32 %v1763_v49, %v1744_v44 }
 0x244   : > { %v1728_v46 = vadd.f32 %v1727_v34, %v1708_v35 }
 0x245   : > { %v1879_v27 = vadd.f32 %v1871_v54, %v1764_v52 }
 0x246   : > { %v1882_v51 = vadd.f32 %v1870_v25, %v1728_v46 }
 0x247   : > { %v1895_v31 = vmax.f32 %v1879_v27, 0.0 }
 0x248   : > { %v1898_v59 = vmax.f32 %v1882_v51, 0.0 }
 0x24a   : > { %v1910_v63 = vpack.c.bf16 %v1898_v59, %v1894_v56  ;;  %v1746_v0 = vpop.f32.mrf.mxu2  ;;  %v1765_v16 = vpop.f32.mrf.mxu3 }
 0x24b   : > { %v1766_v21 = vadd.f32 %v1765_v16, %v1746_v0  ;;  %v1711_v40 = vpop.f32.mrf.mxu0  ;;  %v1730_v26 = vpop.f32.mrf.mxu1 }
 0x24c   : > { %2186 = vmatmul.bf16.vlgmr.msra.gmra.mxu0 %v1910_v63  ;;  %v1731_v41 = vadd.f32 %v1730_v26, %v1711_v40 }
 0x24d   : > { %v1883_v62 = vadd.f32 %v1871_v54, %v1766_v21 }
 0x24e   : > { %v1886_v61 = vadd.f32 %v1870_v25, %v1731_v41 }
 0x24f   : > { %v1899_v36 = vmax.f32 %v1883_v62, 0.0 }
 0x250   : > { %v1902_v14 = vmax.f32 %v1886_v61, 0.0 }
 0x251   : > { %v1911_v48 = vpack.c.bf16 %v1899_v36, %v1895_v31 }
 0x252   : > { %v1749_v53 = vpop.f32.mrf.mxu2  ;;  %v1768_v2 = vpop.f32.mrf.mxu3 }
 0x253   : > { %2205 = vmatmul.bf16.vlgmr.msra.gmra.mxu1 %v1911_v48  ;;  %v1713_v58 = vpop.f32.mrf.mxu0  ;;  %v1732_v4 = vpop.f32.mrf.mxu1  ;;  %v1769_v13 = vadd.f32 %v1768_v2, %v1749_v53 }
 0x254   : > { %v1733_v6 = vadd.f32 %v1732_v4, %v1713_v58  ;;  %v3361_v4 = vld [vmem:[%s4334_s8] ss:$0 sm:$0xff] }
 0x255   : > { %v1887_v8 = vadd.f32 %v1871_v54, %v1769_v13 }
 0x256   : > { %v1890_v10 = vadd.f32 %v1870_v25, %v1733_v6 }
 0x257   : > { %v1903_v7 = vmax.f32 %v1887_v8, 0.0 }
 0x258   : > { %v1906_v18 = vmax.f32 %v1890_v10, 0.0 }
 0x25a   : > { %v1751_v19 = vpop.f32.mrf.mxu2  ;;  %v1770_v22 = vpop.f32.mrf.mxu3  ;;  %v1914_v23 = vpack.c.bf16 %v1906_v18, %v1902_v14 }
 0x25b   : > { %v1771_v24 = vadd.f32 %v1770_v22, %v1751_v19  ;;  %v1802_v30 = vpop.f32.mrf.mxu0  ;;  %v1821_v32 = vpop.f32.mrf.mxu1 }
 0x25c   : > { %2191 = vmatmul.bf16.gmra.mxu0 %v1914_v23  ;;  %v1822_v12 = vadd.f32 %v1821_v32, %v1802_v30 }
 0x25d   : > { %v1891_v57 = vadd.f32 %v1871_v54, %v1771_v24 }
 0x25e   : > { %v1880_v9 = vadd.f32 %v1872_v15, %v1822_v12 }
 0x25f   : > { %v1907_v11 = vmax.f32 %v1891_v57, 0.0 }
 0x260   : > { %v1896_v25 = vmax.f32 %v1880_v9, 0.0 }
 0x261   : > { %v1915_v47 = vpack.c.bf16 %v1907_v11, %v1903_v7 }
 0x262   : > { %v1840_v45 = vpop.f32.mrf.mxu2  ;;  %v1859_v3 = vpop.f32.mrf.mxu3 }
 0x263   : > { %2210 = vmatmul.bf16.gmra.mxu1 %v1915_v47  ;;  %v1804_v1 = vpop.f32.mrf.mxu0  ;;  %v1823_v5 = vpop.f32.mrf.mxu1  ;;  %v1860_v37 = vadd.f32 %v1859_v3, %v1840_v45 }
 0x264   : > { %v1824_v17 = vadd.f32 %v1823_v5, %v1804_v1 }
 0x265   : > { %v1881_v34 = vadd.f32 %v1873_v20, %v1860_v37 }
 0x266   : > { %v1884_v43 = vadd.f32 %v1872_v15, %v1824_v17 }
 0x267   : > { %v1897_v51 = vmax.f32 %v1881_v34, 0.0 }
 0x268   : > { %v1900_v29 = vmax.f32 %v1884_v43, 0.0 }
 0x26a   : > { %v1912_v44 = vpack.c.bf16 %v1900_v29, %v1896_v25  ;;  %v1842_v49 = vpop.f32.mrf.mxu2  ;;  %v1861_v35 = vpop.f32.mrf.mxu3 }
 0x26b   : > { %v1862_v42 = vadd.f32 %v1861_v35, %v1842_v49  ;;  %v1807_v39 = vpop.f32.mrf.mxu0  ;;  %v1826_v46 = vpop.f32.mrf.mxu1 }
 0x26c   : > { %2224 = vmatmul.bf16.vlgmr.msra.gmra.mxu2 %v1912_v44  ;;  %v1827_v54 = vadd.f32 %v1826_v46, %v1807_v39 }
 0x26d   : > { %v1885_v50 = vadd.f32 %v1873_v20, %v1862_v42 }
 0x26e   : > { %v1888_v63 = vadd.f32 %v1872_v15, %v1827_v54 }
 0x26f   : > { %v1901_v52 = vmax.f32 %v1885_v50, 0.0 }
 0x270   : > { %v1904_v21 = vmax.f32 %v1888_v63, 0.0 }
 0x271   : > { %v1913_v55 = vpack.c.bf16 %v1901_v52, %v1897_v51 }
 0x272   : > { %v1845_v56 = vpop.f32.mrf.mxu2  ;;  %v1864_v59 = vpop.f32.mrf.mxu3 }
 0x273   : > { %2243 = vmatmul.bf16.vlgmr.msra.gmra.mxu3 %v1913_v55  ;;  %v1809_v60 = vpop.f32.mrf.mxu0  ;;  %v1828_v33 = vpop.f32.mrf.mxu1  ;;  %v1865_v27 = vadd.f32 %v1864_v59, %v1845_v56 }
 0x274   : > { %v1829_v0 = vadd.f32 %v1828_v33, %v1809_v60 }
 0x275   : > { %v1889_v31 = vadd.f32 %v1873_v20, %v1865_v27 }
 0x276   : > { %v1892_v16 = vadd.f32 %v1872_v15, %v1829_v0 }
 0x277   : > { %v1905_v41 = vmax.f32 %v1889_v31, 0.0 }
 0x278   : > { %v1908_v40 = vmax.f32 %v1892_v16, 0.0 }
 0x27a   : > { %v1847_v26 = vpop.f32.mrf.mxu2  ;;  %v1866_v28 = vpop.f32.mrf.mxu3  ;;  %v1916_v62 = vpack.c.bf16 %v1908_v40, %v1904_v21 }
 0x27b   : > { %v1867_v36 = vadd.f32 %v1866_v28, %v1847_v26 }
 0x27c   : > { %2229 = vmatmul.bf16.gmra.mxu2 %v1916_v62 }
 0x27d   : > { %v1893_v38 = vadd.f32 %v1873_v20, %v1867_v36 }
 0x27f   : > { %v1909_v48 = vmax.f32 %v1893_v38, 0.0 }
 0x281   : > { %v1917_v53 = vpack.c.bf16 %v1909_v48, %v1905_v41 }
 0x283   : > { %2248 = vmatmul.bf16.gmra.mxu3 %v1917_v53 }
 0x2c9   : > { %v2187_v2 = vpop.f32.mrf.mxu0 }
 0x2ca   : > { %v2188_v6 = vadd.f32 %v3361_v4, %v2187_v2 }
 0x2d0   : > { %v2206_v58 = vpop.f32.mrf.mxu1 }
 0x2d1   : > { %v2189_v10 = vpop.f32.mrf.mxu0  ;;  %v2207_v13 = vadd.f32 %v2206_v58, %v2188_v6 }
 0x2d2   : > { %v2190_v8 = vadd.f32 %v3361_v4, %v2189_v10 }
 0x2d8   : > { %v2208_v14 = vpop.f32.mrf.mxu1 }
 0x2d9   : > { %v2209_v24 = vadd.f32 %v2208_v14, %v2190_v8  ;;  %v2192_v30 = vpop.f32.mrf.mxu0 }
 0x2da   : > { %v2193_v15 = vadd.f32 %v3361_v4, %v2192_v30 }
 0x2e0   : > { %v2211_v57 = vpop.f32.mrf.mxu1 }
 0x2e1   : > { %v2212_v47 = vadd.f32 %v2211_v57, %v2193_v15  ;;  %v2194_v3 = vpop.f32.mrf.mxu0 }
 0x2e2   : > { %v2195_v17 = vadd.f32 %v3361_v4, %v2194_v3 }
 0x2e8   : > { %v2213_v9 = vpop.f32.mrf.mxu1 }
 0x2e9   : > { %v2214_v37 = vadd.f32 %v2213_v9, %v2195_v17 }
 0x2ef   : > { %v2225_v61 = vpop.f32.mrf.mxu2 }
 0x2f0   : > { %v2226_v18 = vadd.f32 %v2225_v61, %v2207_v13 }
 0x2f6   : > { %v2244_v19 = vpop.f32.mrf.mxu3 }
 0x2f7   : > { %v2245_v22 = vadd.f32 %v2244_v19, %v2226_v18  ;;  %v2227_v23 = vpop.f32.mrf.mxu2 }
 0x2f8   : > { %v2228_v32 = vadd.f32 %v2227_v23, %v2209_v24 }
 0x2f9   : > { %2254 = vst [vmem:[%s4258_s9] sm:$0xff] %v2245_v22 }
 0x2fe   : > { %v2246_v7 = vpop.f32.mrf.mxu3 }
 0x2ff   : > { %v2247_v11 = vadd.f32 %v2246_v7, %v2228_v32  ;;  %v2230_v12 = vpop.f32.mrf.mxu2 }
 0x300   : > { %v2231_v45 = vadd.f32 %v2230_v12, %v2212_v47 }
 0x301   : > { %2255 = vst [vmem:[%s4258_s9 + $0x8] sm:$0xff] %v2247_v11 }
 0x306   : > { %v2249_v1 = vpop.f32.mrf.mxu3 }
 0x307   : > { %v2250_v5 = vadd.f32 %v2249_v1, %v2231_v45  ;;  %v2232_v43 = vpop.f32.mrf.mxu2 }
 0x308   : > { %v2233_v20 = vadd.f32 %v2232_v43, %v2214_v37 }
 0x309   : > { %2256 = vst [vmem:[%s4258_s9 + $0x10] sm:$0xff] %v2250_v5 }
 0x30d   : > { %2265 = sbr.rel (!%p3792_p11) target bundleno = 817 (0x331), region = 88 }
 0x30e   : > { %v2251_v25 = vpop.f32.mrf.mxu3 }
 0x30f   : > { %v2252_v29 = vadd.f32 %v2251_v25, %v2233_v20 }
 0x311   : > { %2257 = vst [vmem:[%s4258_s9 + $0x18] sm:$0xff] %v2252_v29 }
 0x312   : > { %s4380_s17 = smov (!%p2268_p6, %s2267_s17), 4 }
 0x313   : > { %s3080_s25 = sshll.u32 %s4380_s17, 3 }
 0x314   : > { %s2271_s3 = ssub.s32 32, %s3080_s25 }
 0x315   : > { %s2272_s21 = sshll.u32 %s2271_s3, 4 }
 0x316   : > { %2273 = vsyncadd %s2259_s30, %s2272_s21  ;;  %p4273_p1 = scmp.ne.s32.totalorder %s3080_s25, 0  ;;  %s3250_s14 = sshll.u32 %s3761_s13, 5 }
 0x317   : > { %s4368_s18 = sld [smem:[#allocation27_spill]]  ;;  %s2278_s20 = sshll.u32 %s4258_s9, 4  ;;  %s4282_s20 = int_to_ptr.vmem [resolvable:$true] %s2278_s20 }
 0x318   : > { %s3084_s15 = sshll.u32 %s4380_s17, 7  ;;  %s3581_s24 = sshra.s32 %s4282_s20, 4  ;;  %s3582_s24 = int_to_ptr.vmem [resolvable:$true] %s3581_s24 }
 0x319   : > { %s3583_s19 = sshrl.u32 %s3084_s15, 4  ;;  %s3687_s13 = smov [#allocation14]  }
 0x31a   : > { %s3588_s22 = scalar_lea.vmem %s3582_s24, %s3583_s19  ;;  %s3592_s29 = scalar_lea.vmem %s3687_s13, 64 }
 0x31b   : > { %p3589_p11 = scmp.ne.s32.totalorder %s3582_s24, %s3588_s22  ;;  %p3594_p3 = scmp.lt.s32.totalorder %s3592_s29, %s3588_s22 }
 0x31d   : > { %s2276_s28 = scalar_lea.hbm %s4368_s18, %s3250_s14  ;;  %p3590_p0 = pnand %p3589_p11, %p4273_p1 }
 0x31e   : > { %s2280_s23 = sshll.u32 %s2276_s28, 4  ;;  %s4284_s23 = int_to_ptr.hbm [resolvable:$true] %s2280_s23 }
 0x31f   : > { %p3591_p2 = pneg %p3590_p0 }
 0x321   : > { %p3596_p7 = pnand %p3594_p3, %p3591_p2 }
 0x323   : > { %3599 = shalt.err (!%p3596_p7)
}
 0x324   : > { %s3600_s9 = sshra.s32 %s4284_s23, 4  ;;  %s3611_s14 = scalar_lea.hbm %s4368_s18, 72  ;;  %s3601_s9 = int_to_ptr.hbm [resolvable:$true] %s3600_s9 }
 0x325   : > { %s3607_s25 = scalar_lea.hbm %s3601_s9, %s3583_s19  ;;  %p3612_p13 = scmp.lt.s32.totalorder %s3601_s9, %s4368_s18 }
 0x326   : > { %p3608_p8 = scmp.ne.s32.totalorder %s3601_s9, %s3607_s25  ;;  %p3613_p5 = scmp.lt.s32.totalorder %s3611_s14, %s3607_s25 }
 0x328   : > { %p3609_p4 = pnand %p3608_p8, %p4273_p1  ;;  %p3614_p9 = por %p3613_p5, %p3612_p13 }
 0x32a   : > { %p3610_p12 = pneg %p3609_p4 }
 0x32c   : > { %p3615_p10 = pnand %p3614_p9, %p3610_p12 }
 0x32e   : > { %3618 = shalt.err (!%p3615_p10)
}
 0x32f   : > { %s3688_s28 = smov 128   ;;  %s3689_s24 = smov 8  }
 0x330   : > { %2286 = dma.vmem_to_hbm [thread:$0]  (%p4273_p1), %s4282_s20, %s3084_s15, %s4284_s23, %s2259_s30, %s3688_s28, %s3688_s28, %s3689_s24  }
 0x331 PF: > { %s4369_s19 = sld [smem:[#allocation20_spill]]  ;;  %p3312_p6 = scmp.ge.s32.totalorder %s3670_s12, 2 }
 0x332   : > { %s4370_s22 = sld [smem:[#allocation24_spill]] }
 0x337   : > { %s2295_s13 = sand.u32 1, %s4369_s19  }
 0x338   : > { %p4371_p11 = scmp.ne.s32.totalorder %s4370_s22, 0  ;;  %s2296_s29 = scalar_lea.sflag [#allocation4], %s2295_s13 }
 0x33a   : > { %p3297_p0 = pnand %p3312_p6, %p4371_p11 }
 0x33c   : > { %p3298_p2 = pneg %p3297_p0 }
 0x33e   : > { %3653 = dma.done.wait (%p3298_p2), %s2296_s29, 512  }
 0x33f   : > { %3655 = vsyncadd (%p3298_p2), %s2296_s29, 4294966784  ;;  %s4372_s12 = sld [smem:[#allocation21_spill]]  ;;  %s4374_s30 = smov %s3662_s10 }
 0x340   : > { %s4373_s27 = sld [smem:[#allocation22_spill]]  ;;  %s4375_s10 = smov %s3666_s11 }
 0x345   : > { %p25_p3 = scmp.ge.s32.totalorder %s4372_s12, 5  }
 0x346   : > { %s4376_s11 = smov %s4373_s27 }
 0x347   :  { %27 = sbr.rel (!%p25_p3) target bundleno = 12 (0xc), region = 125 }
 0x34c   :  { %2302 = vsyncpa [#allocation3], 1 }
 0x34d   :  { %2304 = vsyncpa [#allocation3 + $0x1], 1 }
 0x34e   :  { %2305 = vsyncpa [#allocation6], 1 }
 0x34f   :  { %2306 = vsyncpa [#allocation9], 1 }
 0x350   :  { %2307 = vsyncpa [#allocation12], 1 }
 0x351   :  { %2308 = vsyncpa [#allocation4], 1 }
 0x352   :  { %2310 = vsyncpa [#allocation4 + $0x1], 1 }

</bundles_post_ra>
